<compile_context>
chip_gen: v7x
topology: tpu7x:2x2x1
jax: 0.10.0
libtpu: 0.0.40
codegen_flags: <defaults>
</compile_context>

<pallas_src>
import jax
import jax.numpy as jnp
from jax.experimental import pallas as pl
from jax.experimental.pallas import tpu as pltpu

K_IN = 28 * 28          # 784 true input features
K_PAD = 896             # 7 * 128, lane-aligned contraction dim for layer 1
H = 512                 # hidden width
N_OUT = 10              # true number of logits
N_PAD = 128             # lane-dense padded output width
TB_MAX = 256            # max batch (M) tile


def mlp_kernel(x_ref, w1_ref, b1_ref, w2_ref, b2_ref, w3_ref, b3_ref, o_ref):
    # x_ref:  (TB, K_PAD) bf16
    # w1_ref: (K_PAD, H) bf16, b1_ref: (1, H) f32
    # w2_ref: (H, H)     bf16, b2_ref: (1, H) f32
    # w3_ref: (H, N_PAD) bf16, b3_ref: (1, N_PAD) f32
    # o_ref:  (TB, N_PAD) f32
    x = x_ref[...]

    h1 = jnp.dot(x, w1_ref[...], preferred_element_type=jnp.float32) + b1_ref[...]
    h1 = jnp.maximum(h1, 0.0).astype(jnp.bfloat16)

    h2 = jnp.dot(h1, w2_ref[...], preferred_element_type=jnp.float32) + b2_ref[...]
    h2 = jnp.maximum(h2, 0.0).astype(jnp.bfloat16)

    out = jnp.dot(h2, w3_ref[...], preferred_element_type=jnp.float32) + b3_ref[...]
    o_ref[...] = out


@jax.jit
def mlp_forward(x_nchw, params):
    """x_nchw: (B, 1, 28, 28) float32. Returns logits (B, 10) float32."""
    w1, b1, w2, b2, w3, b3 = params
    B = x_nchw.shape[0]

    # Same as torch x.view(-1, 784). Cast to bf16 first (halves pad traffic),
    # then pad features 784->896 (lane-aligned) and batch up to the batch tile.
    x = x_nchw.reshape(B, K_IN).astype(jnp.bfloat16)

    # Adaptive batch tile: whole (16-rounded, bf16-sublane-friendly) batch for
    # small B; TB_MAX for large B to amortize per-grid-step overhead.
    tb = min(TB_MAX, ((B + 15) // 16) * 16)
    bp = pl.cdiv(B, tb) * tb
    x = jnp.pad(x, ((0, bp - B), (0, K_PAD - K_IN)))

    grid = (bp // tb,)

    flops = 2 * bp * (K_PAD * H + H * H + H * N_PAD)
    bytes_accessed = (
        x.size * 2                                   # bf16 activations in
        + (w1.size + w2.size + w3.size) * 2          # bf16 weights (read once)
        + (b1.size + b2.size + b3.size) * 4          # f32 biases
        + bp * N_PAD * 4                             # f32 logits out
    )

    out = pl.pallas_call(
        mlp_kernel,
        out_shape=jax.ShapeDtypeStruct((bp, N_PAD), jnp.float32),
        grid=grid,
        in_specs=[
            pl.BlockSpec((tb, K_PAD), lambda i: (i, 0)),      # x tile streams
            pl.BlockSpec((K_PAD, H), lambda i: (0, 0)),       # w1 resident
            pl.BlockSpec((1, H), lambda i: (0, 0)),           # b1 resident
            pl.BlockSpec((H, H), lambda i: (0, 0)),           # w2 resident
            pl.BlockSpec((1, H), lambda i: (0, 0)),           # b2 resident
            pl.BlockSpec((H, N_PAD), lambda i: (0, 0)),       # w3 resident
            pl.BlockSpec((1, N_PAD), lambda i: (0, 0)),       # b3 resident
        ],
        out_specs=pl.BlockSpec((tb, N_PAD), lambda i: (i, 0)),
        compiler_params=pltpu.CompilerParams(
            dimension_semantics=("parallel",),
            vmem_limit_bytes=32 << 20,
        ),
        cost_estimate=pl.CostEstimate(
            flops=flops, transcendentals=0, bytes_accessed=bytes_accessed
        ),
    )(x, w1, b1, w2, b2, w3, b3)

    return out[:B, :N_OUT]


def init_params(key):
    """Deterministic init mirroring torch nn.Linear defaults:
    U(-1/sqrt(fan_in), 1/sqrt(fan_in)) for both weight and bias.
    Weights stored transposed (in_features, out_features), zero-padded to
    lane-aligned shapes, cast to bf16; biases kept f32 as (1, out_pad)."""
    dims = [(K_IN, H, K_PAD, H), (H, H, H, H), (H, N_OUT, H, N_PAD)]
    params = []
    for i, (fan_in, fan_out, in_pad, out_pad) in enumerate(dims):
        kw, kb = jax.random.split(jax.random.fold_in(key, i))
        bound = 1.0 / (fan_in ** 0.5)
        w = jax.random.uniform(kw, (fan_in, fan_out), jnp.float32, -bound, bound)
        b = jax.random.uniform(kb, (1, fan_out), jnp.float32, -bound, bound)
        w = jnp.pad(w, ((0, in_pad - fan_in), (0, out_pad - fan_out)))
        b = jnp.pad(b, ((0, 0), (0, out_pad - fan_out)))
        params += [w.astype(jnp.bfloat16), b.astype(jnp.float32)]
    return tuple(params)


def reference_forward(x_nchw, params):
    """Pure-jnp reference with the same bf16 operand / f32 accumulation numerics."""
    w1, b1, w2, b2, w3, b3 = params
    B = x_nchw.shape[0]
    x = x_nchw.reshape(B, K_IN).astype(jnp.bfloat16)
    x = jnp.pad(x, ((0, 0), (0, K_PAD - K_IN)))
    h1 = jnp.maximum(
        jnp.dot(x, w1, preferred_element_type=jnp.float32) + b1, 0.0
    ).astype(jnp.bfloat16)
    h2 = jnp.maximum(
        jnp.dot(h1, w2, preferred_element_type=jnp.float32) + b2, 0.0
    ).astype(jnp.bfloat16)
    out = jnp.dot(h2, w3, preferred_element_type=jnp.float32) + b3
    return out[:, :N_OUT]


if __name__ == "__main__":
    key = jax.random.PRNGKey(0)
    params = init_params(key)

    # Small batch of MNIST-shaped inputs (NCHW, like PyTorch).
    x = jax.random.normal(jax.random.fold_in(key, 100), (8, 1, 28, 28), jnp.float32)

    out = mlp_forward(x, params)
    out = jax.block_until_ready(out)

    ref = reference_forward(x, params)
    assert out.shape == (8, N_OUT)
    assert jnp.allclose(out, ref, atol=2e-3, rtol=2e-3), (
        float(jnp.max(jnp.abs(out - ref)))
    )

    print("KERNEL_OK")
</pallas_src>

<mosaic_0001>
module attributes {stable_mosaic.version = 11 : i64} {
  func.func @mlp_kernel(%arg0: i32, %arg1: memref<16x896xbf16, #tpu.memory_space<vmem>>, %arg2: memref<896x512xbf16, #tpu.memory_space<vmem>>, %arg3: memref<1x512xf32, #tpu.memory_space<vmem>>, %arg4: memref<512x512xbf16, #tpu.memory_space<vmem>>, %arg5: memref<1x512xf32, #tpu.memory_space<vmem>>, %arg6: memref<512x128xbf16, #tpu.memory_space<vmem>>, %arg7: memref<1x128xf32, #tpu.memory_space<vmem>>, %arg8: memref<16x128xf32, #tpu.memory_space<vmem>>) attributes {dimension_semantics = [#tpu.dimension_semantics<parallel>], iteration_bounds = array<i64: 1>, scalar_prefetch = 0 : i64, scratch_operands = 0 : i64, tpu.core_type = #tpu.core_type<tc>, window_params = [{transform_indices = @transform_0, window_bounds = array<i64: 16, 896>}, {pipeline_mode = #tpu.pipeline_mode<synchronous>, transform_indices = @transform_1, window_bounds = array<i64: 896, 512>}, {pipeline_mode = #tpu.pipeline_mode<synchronous>, transform_indices = @transform_2, window_bounds = array<i64: 1, 512>}, {pipeline_mode = #tpu.pipeline_mode<synchronous>, transform_indices = @transform_3, window_bounds = array<i64: 512, 512>}, {pipeline_mode = #tpu.pipeline_mode<synchronous>, transform_indices = @transform_4, window_bounds = array<i64: 1, 512>}, {pipeline_mode = #tpu.pipeline_mode<synchronous>, transform_indices = @transform_5, window_bounds = array<i64: 512, 128>}, {pipeline_mode = #tpu.pipeline_mode<synchronous>, transform_indices = @transform_6, window_bounds = array<i64: 1, 128>}, {transform_indices = @transform_7, window_bounds = array<i64: 16, 128>}]} {
    %c0 = arith.constant 0 : index
    %c0_0 = arith.constant 0 : index
    %0 = vector.load %arg1[%c0, %c0_0] : memref<16x896xbf16, #tpu.memory_space<vmem>>, vector<16x896xbf16>
    %c0_1 = arith.constant 0 : index
    %c0_2 = arith.constant 0 : index
    %1 = vector.load %arg2[%c0_1, %c0_2] : memref<896x512xbf16, #tpu.memory_space<vmem>>, vector<896x512xbf16>
    %cst = arith.constant dense<0.000000e+00> : vector<16x512xf32>
    %2 = tpu.matmul %0, %1, %cst {dimension_numbers = #tpu.dot_dimension_numbers<[1], [0], [0], [1], [0, 0, 1, 1], [], []>} : vector<16x896xbf16>, vector<896x512xbf16>, vector<16x512xf32> -> vector<16x512xf32>
    %c0_3 = arith.constant 0 : index
    %c0_4 = arith.constant 0 : index
    %3 = vector.load %arg3[%c0_3, %c0_4] : memref<1x512xf32, #tpu.memory_space<vmem>>, vector<1x512xf32>
    %4 = vector.broadcast %3 : vector<1x512xf32> to vector<16x512xf32>
    %5 = arith.addf %2, %4 : vector<16x512xf32>
    %cst_5 = arith.constant 0.000000e+00 : f32
    %6 = vector.broadcast %cst_5 : f32 to vector<16x512xf32>
    %7 = arith.maximumf %5, %6 : vector<16x512xf32>
    %8 = arith.truncf %7 : vector<16x512xf32> to vector<16x512xbf16>
    %c0_6 = arith.constant 0 : index
    %c0_7 = arith.constant 0 : index
    %9 = vector.load %arg4[%c0_6, %c0_7] : memref<512x512xbf16, #tpu.memory_space<vmem>>, vector<512x512xbf16>
    %cst_8 = arith.constant dense<0.000000e+00> : vector<16x512xf32>
    %10 = tpu.matmul %8, %9, %cst_8 {dimension_numbers = #tpu.dot_dimension_numbers<[1], [0], [0], [1], [0, 0, 1, 1], [], []>} : vector<16x512xbf16>, vector<512x512xbf16>, vector<16x512xf32> -> vector<16x512xf32>
    %c0_9 = arith.constant 0 : index
    %c0_10 = arith.constant 0 : index
    %11 = vector.load %arg5[%c0_9, %c0_10] : memref<1x512xf32, #tpu.memory_space<vmem>>, vector<1x512xf32>
    %12 = vector.broadcast %11 : vector<1x512xf32> to vector<16x512xf32>
    %13 = arith.addf %10, %12 : vector<16x512xf32>
    %cst_11 = arith.constant 0.000000e+00 : f32
    %14 = vector.broadcast %cst_11 : f32 to vector<16x512xf32>
    %15 = arith.maximumf %13, %14 : vector<16x512xf32>
    %16 = arith.truncf %15 : vector<16x512xf32> to vector<16x512xbf16>
    %c0_12 = arith.constant 0 : index
    %c0_13 = arith.constant 0 : index
    %17 = vector.load %arg6[%c0_12, %c0_13] : memref<512x128xbf16, #tpu.memory_space<vmem>>, vector<512x128xbf16>
    %cst_14 = arith.constant dense<0.000000e+00> : vector<16x128xf32>
    %18 = tpu.matmul %16, %17, %cst_14 {dimension_numbers = #tpu.dot_dimension_numbers<[1], [0], [0], [1], [0, 0, 1, 1], [], []>} : vector<16x512xbf16>, vector<512x128xbf16>, vector<16x128xf32> -> vector<16x128xf32>
    %c0_15 = arith.constant 0 : index
    %c0_16 = arith.constant 0 : index
    %19 = vector.load %arg7[%c0_15, %c0_16] : memref<1x128xf32, #tpu.memory_space<vmem>>, vector<1x128xf32>
    %20 = vector.broadcast %19 : vector<1x128xf32> to vector<16x128xf32>
    %21 = arith.addf %18, %20 : vector<16x128xf32>
    %c0_17 = arith.constant 0 : index
    %c0_18 = arith.constant 0 : index
    %22 = vector.load %arg8[%c0_17, %c0_18] : memref<16x128xf32, #tpu.memory_space<vmem>>, vector<16x128xf32>
    tpu.vector_store %arg8[%c0_17, %c0_18], %21 {strides = array<i32>} : memref<16x128xf32, #tpu.memory_space<vmem>>, vector<16x128xf32>,
    return
  }
  func.func @transform_0(%arg0: i32) -> (i32, i32) {
    %c0_i32 = arith.constant 0 : i32
    %c0_i32_0 = arith.constant 0 : i32
    return %arg0, %c0_i32 : i32, i32
  }
  func.func @transform_1(%arg0: i32) -> (i32, i32) {
    %c0_i32 = arith.constant 0 : i32
    %c0_i32_0 = arith.constant 0 : i32
    %c0_i32_1 = arith.constant 0 : i32
    return %c0_i32, %c0_i32_0 : i32, i32
  }
  func.func @transform_2(%arg0: i32) -> (i32, i32) {
    %c0_i32 = arith.constant 0 : i32
    %c0_i32_0 = arith.constant 0 : i32
    %c0_i32_1 = arith.constant 0 : i32
    return %c0_i32, %c0_i32_0 : i32, i32
  }
  func.func @transform_3(%arg0: i32) -> (i32, i32) {
    %c0_i32 = arith.constant 0 : i32
    %c0_i32_0 = arith.constant 0 : i32
    %c0_i32_1 = arith.constant 0 : i32
    return %c0_i32, %c0_i32_0 : i32, i32
  }
  func.func @transform_4(%arg0: i32) -> (i32, i32) {
    %c0_i32 = arith.constant 0 : i32
    %c0_i32_0 = arith.constant 0 : i32
    %c0_i32_1 = arith.constant 0 : i32
    return %c0_i32, %c0_i32_0 : i32, i32
  }
  func.func @transform_5(%arg0: i32) -> (i32, i32) {
    %c0_i32 = arith.constant 0 : i32
    %c0_i32_0 = arith.constant 0 : i32
    %c0_i32_1 = arith.constant 0 : i32
    return %c0_i32, %c0_i32_0 : i32, i32
  }
  func.func @transform_6(%arg0: i32) -> (i32, i32) {
    %c0_i32 = arith.constant 0 : i32
    %c0_i32_0 = arith.constant 0 : i32
    %c0_i32_1 = arith.constant 0 : i32
    return %c0_i32, %c0_i32_0 : i32, i32
  }
  func.func @transform_7(%arg0: i32) -> (i32, i32) {
    %c0_i32 = arith.constant 0 : i32
    %c0_i32_0 = arith.constant 0 : i32
    return %arg0, %c0_i32 : i32, i32
  }
}

</mosaic_0001>

<bundles_post_ra>
// kernel: mlp_forward.1
= control target key start
LH: loop header
LB: loop body
LE: loop exit
PB: predicated region body
PF: predicated region fallthrough
CT: control target
= control target key end

     0   :  { %12 = vsyncpa [#allocation3], 0  ;;  %s4482_s0 = inlined_call_operand.vmem [shape: bf16[16,896], index: 0, kind: input, shape index: {}]   ;;  %s4483_s1 = inlined_call_operand.hbm [shape: bf16[896,512], index: 1, kind: input, shape index: {}]   ;;  %s4484_s2 = inlined_call_operand.vmem [shape: f32[1,512], index: 2, kind: input, shape index: {}]   ;;  %s4485_s3 = inlined_call_operand.hbm [shape: bf16[512,512], index: 3, kind: input, shape index: {}]   ;;  %s4486_s4 = inlined_call_operand.vmem [shape: f32[1,512], index: 4, kind: input, shape index: {}]   ;;  %s4487_s5 = inlined_call_operand.vmem [shape: bf16[512,128], index: 5, kind: input, shape index: {}]   ;;  %s4488_s6 = inlined_call_operand.vmem [shape: f32[1,128], index: 6, kind: input, shape index: {}]   ;;  %s4489_s7 = inlined_call_operand.vmem [shape: f32[16,128], index: 7, kind: output, shape index: {}]  }
   0x1   :  { %13 = vsyncpa [#allocation5], 0  ;;  %s4255_s24 = smov [#allocation2]   ;;  %s4207_s28 = scalar_lea.hbm %s4483_s1, 28672 }
   0x2   :  { %s21_s25 = sshll.u32 %s4255_s24, 4  ;;  %p4208_p0 = scmp.ne.s32.totalorder %s4483_s1, %s4207_s28  ;;  %s22_s25 = int_to_ptr.vmem [resolvable:$true] %s21_s25 }
   0x3   :  { %p4211_p1 = scmp.lt.u32.totalorder %s4207_s28, %s4483_s1 }
   0x5   :  { %p4213_p2 = pnand %p4211_p1, %p4208_p0 }
   0x7   :  { %4216 = shalt.err (!%p4213_p2)
}
   0x8   :  { %s4217_s10 = scalar_lea.vmem %s22_s25, 28672  ;;  %p4222_p4 = scmp.lt.s32.totalorder %s22_s25, %s22_s25 }
   0x9   :  { %p4218_p3 = scmp.ne.s32.totalorder %s22_s25, %s4217_s10  ;;  %p4223_p5 = scmp.lt.s32.totalorder %s4217_s10, %s4217_s10 }
   0xb   :  { %p4224_p6 = por %p4223_p5, %p4222_p4 }
   0xd   :  { %p4225_p7 = pnand %p4224_p6, %p4218_p3 }
   0xf   :  { %4228 = shalt.err (!%p4225_p7)
}
  0x10   :  { %s4256_s11 = smov 256   ;;  %s4257_s12 = smov 16  }
  0x11   :  { %27 = dma.hbm_to_vmem [thread:$0]  %s4483_s1, 28672, %s22_s25, [#allocation3], %s4256_s11, %s4256_s11, %s4257_s12  }
  0x12   :  { %s4258_s15 = smov [#allocation4]   ;;  %s4229_s19 = scalar_lea.hbm %s4485_s3, 16384 }
  0x13   :  { %s35_s16 = sshll.u32 %s4258_s15, 4  ;;  %p4230_p8 = scmp.ne.s32.totalorder %s4485_s3, %s4229_s19  ;;  %s36_s16 = int_to_ptr.vmem [resolvable:$true] %s35_s16 }
  0x14   :  { %p4233_p9 = scmp.lt.u32.totalorder %s4229_s19, %s4485_s3 }
  0x16   :  { %p4235_p10 = pnand %p4233_p9, %p4230_p8 }
  0x18   :  { %4238 = shalt.err (!%p4235_p10)
}
  0x19   :  { %s4239_s24 = scalar_lea.vmem %s36_s16, 16384  ;;  %p4244_p12 = scmp.lt.s32.totalorder %s36_s16, %s36_s16 }
  0x1a   :  { %p4240_p11 = scmp.ne.s32.totalorder %s36_s16, %s4239_s24  ;;  %p4245_p13 = scmp.lt.s32.totalorder %s4239_s24, %s4239_s24 }
  0x1c   :  { %p4246_p0 = por %p4245_p13, %p4244_p12 }
  0x1e   :  { %p4247_p1 = pnand %p4246_p0, %p4240_p11 }
  0x20   :  { %4250 = shalt.err (!%p4247_p1)
}
  0x21   :  { %41 = dma.hbm_to_vmem [thread:$0]  %s4485_s3, 16384, %s36_s16, [#allocation5], %s4256_s11, %s4256_s11, %s4257_s12  }
  0x22   :  { %4251 = dma.done.wait [#allocation3], 28672  }
  0x23   :  { %4252 = vsyncadd [#allocation3], 4294938624 }
  0x24   :  { %4253 = dma.done.wait [#allocation5], 16384  }
  0x25   :  { %4254 = vsyncadd [#allocation5], 4294950912  ;;  %v3637_v0 = vld [vmem:[#allocation2 + $0x4] ss:$16 sps:$4 sm:$0xff]   ;;  %v3639_v1 = vld [vmem:[#allocation2 + $0xc] ss:$16 sps:$4 sm:$0xff]  }
  0x26   :  { %1465 = vmatprep.subr.bf16.mxu0 %v3637_v0  ;;  %v3641_v2 = vld [vmem:[#allocation2] ss:$16 sps:$4 sm:$0xff]   ;;  %v3642_v3 = vld [vmem:[#allocation2 + $0x8] ss:$16 sps:$4 sm:$0xff]   ;;  %1637 = vmatprep.subr.bf16.mxu1 %v3639_v1  ;;  %v3643_v4 = vld [vmem:[#allocation2 + $0x24] ss:$16 sps:$4 sm:$0xff]  }
  0x27   :  { %1466 = vmatpush1.bf16.msra.mxu0 %v3641_v2  ;;  %1638 = vmatpush1.bf16.msra.mxu1 %v3642_v3  ;;  %v3645_v5 = vld [vmem:[#allocation2 + $0x2c] ss:$16 sps:$4 sm:$0xff]   ;;  %v3647_v6 = vld [vmem:[#allocation2 + $0x20] ss:$16 sps:$4 sm:$0xff]   ;;  %v3648_v7 = vld [vmem:[#allocation2 + $0x28] ss:$16 sps:$4 sm:$0xff]  }
  0x28   :  { %1467 = vmatprep.subr.bf16.mxu0 %v3643_v4  ;;  %1639 = vmatprep.subr.bf16.mxu1 %v3645_v5  ;;  %v3649_v8 = vld [vmem:[#allocation2 + $0x44] ss:$16 sps:$4 sm:$0xff]   ;;  %v3651_v9 = vld [vmem:[#allocation2 + $0x4c] ss:$16 sps:$4 sm:$0xff]   ;;  %v3653_v10 = vld [vmem:[#allocation2 + $0x40] ss:$16 sps:$4 sm:$0xff]  }
  0x29   :  { %v3654_v11 = vld [vmem:[#allocation2 + $0x48] ss:$16 sps:$4 sm:$0xff]   ;;  %v3655_v12 = vld [vmem:[#allocation2 + $0x64] ss:$16 sps:$4 sm:$0xff]   ;;  %v3657_v13 = vld [vmem:[#allocation2 + $0x6c] ss:$16 sps:$4 sm:$0xff]  }
  0x2a   :  { %v3659_v14 = vld [vmem:[#allocation2 + $0x60] ss:$16 sps:$4 sm:$0xff]   ;;  %v3660_v15 = vld [vmem:[#allocation2 + $0x68] ss:$16 sps:$4 sm:$0xff]   ;;  %v3661_v16 = vld [vmem:[#allocation2 + $0x84] ss:$16 sps:$4 sm:$0xff]  }
  0x2b   :  { %1468 = vmatpush1.bf16.msra.mxu0 %v3647_v6  ;;  %1640 = vmatpush1.bf16.msra.mxu1 %v3648_v7  ;;  %v3663_v17 = vld [vmem:[#allocation2 + $0x8c] ss:$16 sps:$4 sm:$0xff]   ;;  %v3665_v18 = vld [vmem:[#allocation2 + $0x80] ss:$16 sps:$4 sm:$0xff]   ;;  %v3666_v19 = vld [vmem:[#allocation2 + $0x88] ss:$16 sps:$4 sm:$0xff]  }
  0x2c   :  { %1469 = vmatprep.subr.bf16.mxu0 %v3649_v8  ;;  %1641 = vmatprep.subr.bf16.mxu1 %v3651_v9  ;;  %v3667_v20 = vld [vmem:[#allocation2 + $0xa4] ss:$16 sps:$4 sm:$0xff]   ;;  %v3669_v21 = vld [vmem:[#allocation2 + $0xac] ss:$16 sps:$4 sm:$0xff]   ;;  %v3671_v22 = vld [vmem:[#allocation2 + $0xa0] ss:$16 sps:$4 sm:$0xff]  }
  0x2d   :  { %v3672_v23 = vld [vmem:[#allocation2 + $0xa8] ss:$16 sps:$4 sm:$0xff]   ;;  %v3673_v24 = vld [vmem:[#allocation2 + $0xc4] ss:$16 sps:$4 sm:$0xff]   ;;  %v3675_v25 = vld [vmem:[#allocation2 + $0xcc] ss:$16 sps:$4 sm:$0xff]  }
  0x2e   :  { %v3677_v26 = vld [vmem:[#allocation2 + $0xc0] ss:$16 sps:$4 sm:$0xff]   ;;  %v3678_v27 = vld [vmem:[#allocation2 + $0xc8] ss:$16 sps:$4 sm:$0xff]   ;;  %v3679_v28 = vld [vmem:[#allocation2 + $0xe4] ss:$16 sps:$4 sm:$0xff]  }
  0x2f   :  { %1470 = vmatpush1.bf16.msra.mxu0 %v3653_v10  ;;  %1642 = vmatpush1.bf16.msra.mxu1 %v3654_v11  ;;  %v3681_v29 = vld [vmem:[#allocation2 + $0xec] ss:$16 sps:$4 sm:$0xff]   ;;  %v3683_v30 = vld [vmem:[#allocation2 + $0xe0] ss:$16 sps:$4 sm:$0xff]   ;;  %v3684_v31 = vld [vmem:[#allocation2 + $0xe8] ss:$16 sps:$4 sm:$0xff]  }
  0x30   :  { %1471 = vmatprep.subr.bf16.mxu0 %v3655_v12  ;;  %1643 = vmatprep.subr.bf16.mxu1 %v3657_v13  ;;  %v3685_v32 = vld [vmem:[#allocation2 + $0x104] ss:$16 sps:$4 sm:$0xff]   ;;  %v3687_v33 = vld [vmem:[#allocation2 + $0x10c] ss:$16 sps:$4 sm:$0xff]   ;;  %v3689_v34 = vld [vmem:[#allocation2 + $0x100] ss:$16 sps:$4 sm:$0xff]  }
  0x31   :  { %v3690_v35 = vld [vmem:[#allocation2 + $0x108] ss:$16 sps:$4 sm:$0xff]   ;;  %v3691_v36 = vld [vmem:[#allocation2 + $0x124] ss:$16 sps:$4 sm:$0xff]   ;;  %v3693_v37 = vld [vmem:[#allocation2 + $0x12c] ss:$16 sps:$4 sm:$0xff]  }
  0x32   :  { %v3695_v38 = vld [vmem:[#allocation2 + $0x120] ss:$16 sps:$4 sm:$0xff]   ;;  %v3696_v39 = vld [vmem:[#allocation2 + $0x128] ss:$16 sps:$4 sm:$0xff]   ;;  %v3697_v40 = vld [vmem:[#allocation2 + $0x144] ss:$16 sps:$4 sm:$0xff]  }
  0x33   :  { %1472 = vmatpush1.bf16.msra.mxu0 %v3659_v14  ;;  %1644 = vmatpush1.bf16.msra.mxu1 %v3660_v15  ;;  %v3699_v41 = vld [vmem:[#allocation2 + $0x14c] ss:$16 sps:$4 sm:$0xff]   ;;  %v3701_v42 = vld [vmem:[#allocation2 + $0x140] ss:$16 sps:$4 sm:$0xff]   ;;  %v3702_v43 = vld [vmem:[#allocation2 + $0x148] ss:$16 sps:$4 sm:$0xff]  }
  0x34   :  { %1473 = vmatprep.subr.bf16.mxu0 %v3661_v16  ;;  %1645 = vmatprep.subr.bf16.mxu1 %v3663_v17  ;;  %v3703_v44 = vld [vmem:[#allocation2 + $0x164] ss:$16 sps:$4 sm:$0xff]   ;;  %v3705_v45 = vld [vmem:[#allocation2 + $0x16c] ss:$16 sps:$4 sm:$0xff]   ;;  %v3707_v46 = vld [vmem:[#allocation2 + $0x160] ss:$16 sps:$4 sm:$0xff]  }
  0x35   :  { %v3708_v47 = vld [vmem:[#allocation2 + $0x168] ss:$16 sps:$4 sm:$0xff]   ;;  %v3735_v48 = vld [vmem:[%s4482_s0 + $0x4] ss:$28 sps:$4 sm:$0xff]   ;;  %v3711_v50 = vld [vmem:[#allocation2 + $0x18c] ss:$16 sps:$4 sm:$0xff]  }
  0x36   :  { %v3709_v49 = vld [vmem:[#allocation2 + $0x184] ss:$16 sps:$4 sm:$0xff]   ;;  %1497 = vmatprep.mubr.bf16.mxu0 %v3735_v48  ;;  %1669 = vmatprep.mubr.bf16.mxu1 %v3735_v48  ;;  %v3713_v51 = vld [vmem:[#allocation2 + $0x180] ss:$16 sps:$4 sm:$0xff]   ;;  %v3714_v52 = vld [vmem:[#allocation2 + $0x188] ss:$16 sps:$4 sm:$0xff]  }
  0x37   :  { %1474 = vmatpush1.bf16.msra.mxu0 %v3665_v18  ;;  %1646 = vmatpush1.bf16.msra.mxu1 %v3666_v19  ;;  %v3715_v53 = vld [vmem:[#allocation2 + $0x1a4] ss:$16 sps:$4 sm:$0xff]   ;;  %v3717_v54 = vld [vmem:[#allocation2 + $0x1ac] ss:$16 sps:$4 sm:$0xff]   ;;  %v3719_v55 = vld [vmem:[#allocation2 + $0x1a0] ss:$16 sps:$4 sm:$0xff]  }
  0x38   :  { %1475 = vmatprep.subr.bf16.mxu0 %v3667_v20  ;;  %1647 = vmatprep.subr.bf16.mxu1 %v3669_v21  ;;  %v3720_v56 = vld [vmem:[#allocation2 + $0x1a8] ss:$16 sps:$4 sm:$0xff]   ;;  %v3721_v57 = vld [vmem:[#allocation2 + $0x1c4] ss:$16 sps:$4 sm:$0xff]   ;;  %v3723_v58 = vld [vmem:[#allocation2 + $0x1cc] ss:$16 sps:$4 sm:$0xff]  }
  0x39   :  { %v3725_v59 = vld [vmem:[#allocation2 + $0x1c0] ss:$16 sps:$4 sm:$0xff]   ;;  %v3726_v60 = vld [vmem:[#allocation2 + $0x1c8] ss:$16 sps:$4 sm:$0xff]   ;;  %v3727_v61 = vld [vmem:[#allocation2 + $0x1e4] ss:$16 sps:$4 sm:$0xff]  }
  0x3a   :  { %v3729_v62 = vld [vmem:[#allocation2 + $0x1ec] ss:$16 sps:$4 sm:$0xff]   ;;  %v3731_v63 = vld [vmem:[#allocation2 + $0x1e0] ss:$16 sps:$4 sm:$0xff]   ;;  %v3732_v0 = vld [vmem:[#allocation2 + $0x1e8] ss:$16 sps:$4 sm:$0xff]  }
  0x3b   :  { %1476 = vmatpush1.bf16.msra.mxu0 %v3671_v22  ;;  %1648 = vmatpush1.bf16.msra.mxu1 %v3672_v23  ;;  %v3738_v1 = vld [vmem:[#allocation2 + $0x204] ss:$16 sps:$4 sm:$0xff]   ;;  %v3741_v2 = vld [vmem:[#allocation2 + $0x20c] ss:$16 sps:$4 sm:$0xff]   ;;  %v3736_v4 = vld [vmem:[#allocation2 + $0x200] ss:$16 sps:$4 sm:$0xff]  }
  0x3c   :  { %1477 = vmatprep.subr.bf16.mxu0 %v3673_v24  ;;  %1649 = vmatprep.subr.bf16.mxu1 %v3675_v25  ;;  %v3733_v3 = vld [vmem:[%s4482_s0] ss:$28 sps:$4 sm:$0xff]   ;;  %v3739_v5 = vld [vmem:[#allocation2 + $0x208] ss:$16 sps:$4 sm:$0xff]   ;;  %v3744_v6 = vld [vmem:[#allocation2 + $0x224] ss:$16 sps:$4 sm:$0xff]  }
  0x3d   :  { %v3747_v7 = vld [vmem:[#allocation2 + $0x22c] ss:$16 sps:$4 sm:$0xff]   ;;  %v3742_v8 = vld [vmem:[#allocation2 + $0x220] ss:$16 sps:$4 sm:$0xff]   ;;  %v3745_v9 = vld [vmem:[#allocation2 + $0x228] ss:$16 sps:$4 sm:$0xff]  }
  0x3e   :  { %v3750_v10 = vld [vmem:[#allocation2 + $0x244] ss:$16 sps:$4 sm:$0xff]   ;;  %v3753_v11 = vld [vmem:[#allocation2 + $0x24c] ss:$16 sps:$4 sm:$0xff]   ;;  %v3748_v12 = vld [vmem:[#allocation2 + $0x240] ss:$16 sps:$4 sm:$0xff]  }
  0x3f   :  { %1478 = vmatpush1.bf16.msra.mxu0 %v3677_v26  ;;  %1650 = vmatpush1.bf16.msra.mxu1 %v3678_v27  ;;  %v3751_v13 = vld [vmem:[#allocation2 + $0x248] ss:$16 sps:$4 sm:$0xff]   ;;  %v3756_v14 = vld [vmem:[#allocation2 + $0x264] ss:$16 sps:$4 sm:$0xff]   ;;  %v3759_v15 = vld [vmem:[#allocation2 + $0x26c] ss:$16 sps:$4 sm:$0xff]  }
  0x40   :  { %1479 = vmatprep.subr.bf16.mxu0 %v3679_v28  ;;  %1651 = vmatprep.subr.bf16.mxu1 %v3681_v29  ;;  %v3754_v16 = vld [vmem:[#allocation2 + $0x260] ss:$16 sps:$4 sm:$0xff]   ;;  %v3757_v17 = vld [vmem:[#allocation2 + $0x268] ss:$16 sps:$4 sm:$0xff]   ;;  %v3762_v18 = vld [vmem:[#allocation2 + $0x284] ss:$16 sps:$4 sm:$0xff]  }
  0x41   :  { %v3765_v19 = vld [vmem:[#allocation2 + $0x28c] ss:$16 sps:$4 sm:$0xff]   ;;  %v3760_v20 = vld [vmem:[#allocation2 + $0x280] ss:$16 sps:$4 sm:$0xff]   ;;  %v3763_v21 = vld [vmem:[#allocation2 + $0x288] ss:$16 sps:$4 sm:$0xff]  }
  0x42   :  { %v3768_v22 = vld [vmem:[#allocation2 + $0x2a4] ss:$16 sps:$4 sm:$0xff]   ;;  %v3771_v23 = vld [vmem:[#allocation2 + $0x2ac] ss:$16 sps:$4 sm:$0xff]   ;;  %v3766_v24 = vld [vmem:[#allocation2 + $0x2a0] ss:$16 sps:$4 sm:$0xff]  }
  0x43   :  { %1480 = vmatpush1.bf16.msra.mxu0 %v3683_v30  ;;  %1652 = vmatpush1.bf16.msra.mxu1 %v3684_v31  ;;  %v3769_v25 = vld [vmem:[#allocation2 + $0x2a8] ss:$16 sps:$4 sm:$0xff]   ;;  %v3774_v26 = vld [vmem:[#allocation2 + $0x2c4] ss:$16 sps:$4 sm:$0xff]   ;;  %v3777_v27 = vld [vmem:[#allocation2 + $0x2cc] ss:$16 sps:$4 sm:$0xff]  }
  0x44   :  { %1481 = vmatprep.subr.bf16.mxu0 %v3685_v32  ;;  %1653 = vmatprep.subr.bf16.mxu1 %v3687_v33  ;;  %v3772_v28 = vld [vmem:[#allocation2 + $0x2c0] ss:$16 sps:$4 sm:$0xff]   ;;  %v3775_v29 = vld [vmem:[#allocation2 + $0x2c8] ss:$16 sps:$4 sm:$0xff]   ;;  %v3780_v31 = vld [vmem:[#allocation2 + $0x2e4] ss:$16 sps:$4 sm:$0xff]  }
  0x45   :  { %v3834_v30 = vld [vmem:[%s4482_s0 + $0xc] ss:$28 sps:$4 sm:$0xff]   ;;  %v3778_v33 = vld [vmem:[#allocation2 + $0x2e0] ss:$16 sps:$4 sm:$0xff]  }
  0x46   :  { %v3783_v32 = vld [vmem:[#allocation2 + $0x2ec] ss:$16 sps:$4 sm:$0xff]  }
  0x47   :  { %1482 = vmatpush1.bf16.msra.mxu0 %v3689_v34  ;;  %1654 = vmatpush1.bf16.msra.mxu1 %v3690_v35  ;;  %v3781_v34 = vld [vmem:[#allocation2 + $0x2e8] ss:$16 sps:$4 sm:$0xff]   ;;  %v3786_v35 = vld [vmem:[#allocation2 + $0x304] ss:$16 sps:$4 sm:$0xff]   ;;  %v3807_v48 = vld [vmem:[#allocation2 + $0x36c] ss:$16 sps:$4 sm:$0xff]  }
  0x48   :  { %1483 = vmatprep.subr.bf16.mxu0 %v3691_v36  ;;  %1655 = vmatprep.subr.bf16.mxu1 %v3693_v37  ;;  %v3789_v36 = vld [vmem:[#allocation2 + $0x30c] ss:$16 sps:$4 sm:$0xff]   ;;  %v3784_v37 = vld [vmem:[#allocation2 + $0x300] ss:$16 sps:$4 sm:$0xff]  }
  0x4b   :  { %1484 = vmatpush1.bf16.msra.mxu0 %v3695_v38  ;;  %1656 = vmatpush1.bf16.msra.mxu1 %v3696_v39  ;;  %v3787_v38 = vld [vmem:[#allocation2 + $0x308] ss:$16 sps:$4 sm:$0xff]   ;;  %v3792_v39 = vld [vmem:[#allocation2 + $0x324] ss:$16 sps:$4 sm:$0xff]  }
  0x4c   :  { %1485 = vmatprep.subr.bf16.mxu0 %v3697_v40  ;;  %1657 = vmatprep.subr.bf16.mxu1 %v3699_v41  ;;  %v3795_v40 = vld [vmem:[#allocation2 + $0x32c] ss:$16 sps:$4 sm:$0xff]   ;;  %v3790_v41 = vld [vmem:[#allocation2 + $0x320] ss:$16 sps:$4 sm:$0xff]  }
  0x4f   :  { %1486 = vmatpush1.bf16.msra.mxu0 %v3701_v42  ;;  %1658 = vmatpush1.bf16.msra.mxu1 %v3702_v43  ;;  %v3793_v42 = vld [vmem:[#allocation2 + $0x328] ss:$16 sps:$4 sm:$0xff]   ;;  %v3798_v43 = vld [vmem:[#allocation2 + $0x344] ss:$16 sps:$4 sm:$0xff]  }
  0x50   :  { %1487 = vmatprep.subr.bf16.mxu0 %v3703_v44  ;;  %1659 = vmatprep.subr.bf16.mxu1 %v3705_v45  ;;  %v3801_v44 = vld [vmem:[#allocation2 + $0x34c] ss:$16 sps:$4 sm:$0xff]   ;;  %v3796_v45 = vld [vmem:[#allocation2 + $0x340] ss:$16 sps:$4 sm:$0xff]  }
  0x53   :  { %1488 = vmatpush1.bf16.msra.mxu0 %v3707_v46  ;;  %1660 = vmatpush1.bf16.msra.mxu1 %v3708_v47  ;;  %v3799_v46 = vld [vmem:[#allocation2 + $0x348] ss:$16 sps:$4 sm:$0xff]   ;;  %v3804_v47 = vld [vmem:[#allocation2 + $0x364] ss:$16 sps:$4 sm:$0xff]  }
  0x54   :  { %1489 = vmatprep.subr.bf16.mxu0 %v3709_v49  ;;  %1661 = vmatprep.subr.bf16.mxu1 %v3711_v50  ;;  %v3802_v49 = vld [vmem:[#allocation2 + $0x360] ss:$16 sps:$4 sm:$0xff]   ;;  %v3805_v50 = vld [vmem:[#allocation2 + $0x368] ss:$16 sps:$4 sm:$0xff]  }
  0x57   :  { %1490 = vmatpush1.bf16.msra.mxu0 %v3713_v51  ;;  %1662 = vmatpush1.bf16.msra.mxu1 %v3714_v52  ;;  %v3810_v51 = vld [vmem:[#allocation2 + $0x384] ss:$16 sps:$4 sm:$0xff]   ;;  %v3813_v52 = vld [vmem:[#allocation2 + $0x38c] ss:$16 sps:$4 sm:$0xff]  }
  0x58   :  { %1491 = vmatprep.subr.bf16.mxu0 %v3715_v53  ;;  %1663 = vmatprep.subr.bf16.mxu1 %v3717_v54  ;;  %v3808_v53 = vld [vmem:[#allocation2 + $0x380] ss:$16 sps:$4 sm:$0xff]   ;;  %v3811_v54 = vld [vmem:[#allocation2 + $0x388] ss:$16 sps:$4 sm:$0xff]  }
  0x5b   :  { %1492 = vmatpush1.bf16.msra.mxu0 %v3719_v55  ;;  %1664 = vmatpush1.bf16.msra.mxu1 %v3720_v56  ;;  %v3816_v55 = vld [vmem:[#allocation2 + $0x3a4] ss:$16 sps:$4 sm:$0xff]   ;;  %v3819_v56 = vld [vmem:[#allocation2 + $0x3ac] ss:$16 sps:$4 sm:$0xff]  }
  0x5c   :  { %1493 = vmatprep.subr.bf16.mxu0 %v3721_v57  ;;  %1665 = vmatprep.subr.bf16.mxu1 %v3723_v58  ;;  %v3814_v57 = vld [vmem:[#allocation2 + $0x3a0] ss:$16 sps:$4 sm:$0xff]   ;;  %v3817_v58 = vld [vmem:[#allocation2 + $0x3a8] ss:$16 sps:$4 sm:$0xff]  }
  0x5f   :  { %1494 = vmatpush1.bf16.msra.mxu0 %v3725_v59  ;;  %1666 = vmatpush1.bf16.msra.mxu1 %v3726_v60  ;;  %v3822_v59 = vld [vmem:[#allocation2 + $0x3c4] ss:$16 sps:$4 sm:$0xff]   ;;  %v3825_v60 = vld [vmem:[#allocation2 + $0x3cc] ss:$16 sps:$4 sm:$0xff]  }
  0x60   :  { %1495 = vmatprep.subr.bf16.mxu0 %v3727_v61  ;;  %1667 = vmatprep.subr.bf16.mxu1 %v3729_v62  ;;  %v3820_v61 = vld [vmem:[#allocation2 + $0x3c0] ss:$16 sps:$4 sm:$0xff]   ;;  %v3823_v62 = vld [vmem:[#allocation2 + $0x3c8] ss:$16 sps:$4 sm:$0xff]  }
  0x63   :  { %1496 = vmatpush1.bf16.msra.mxu0 %v3731_v63  ;;  %1668 = vmatpush1.bf16.msra.mxu1 %v3732_v0  ;;  %v3828_v63 = vld [vmem:[#allocation2 + $0x3e4] ss:$16 sps:$4 sm:$0xff]   ;;  %v3831_v0 = vld [vmem:[#allocation2 + $0x3ec] ss:$16 sps:$4 sm:$0xff]  }
  0x64   :  { %1508 = vmatprep.subr.bf16.mxu0 %v3738_v1  ;;  %1680 = vmatprep.subr.bf16.mxu1 %v3741_v2  ;;  %v3826_v1 = vld [vmem:[#allocation2 + $0x3e0] ss:$16 sps:$4 sm:$0xff]   ;;  %v3829_v2 = vld [vmem:[#allocation2 + $0x3e8] ss:$16 sps:$4 sm:$0xff]  }
  0x66   :  { %1498 = vmatmul.mubr.bf16.vlgmr.msra.gmra.mrb[0].mxu0 %v3733_v3  ;;  %1670 = vmatmul.mubr.bf16.vlgmr.msra.gmra.mrb[0].mxu1 %v3733_v3  ;;  %v3837_v3 = vld [vmem:[#allocation2 + $0x404] ss:$16 sps:$4 sm:$0xff]  }
  0x67   :  { %1509 = vmatpush1.bf16.msra.mxu0 %v3736_v4  ;;  %1681 = vmatpush1.bf16.msra.mxu1 %v3739_v5  ;;  %v3840_v4 = vld [vmem:[#allocation2 + $0x40c] ss:$16 sps:$4 sm:$0xff]   ;;  %v3832_v5 = vld [vmem:[%s4482_s0 + $0x8] ss:$28 sps:$4 sm:$0xff]  }
  0x68   :  { %1510 = vmatprep.subr.bf16.mxu0 %v3744_v6  ;;  %1682 = vmatprep.subr.bf16.mxu1 %v3747_v7  ;;  %v3835_v6 = vld [vmem:[#allocation2 + $0x400] ss:$16 sps:$4 sm:$0xff]   ;;  %v3838_v7 = vld [vmem:[#allocation2 + $0x408] ss:$16 sps:$4 sm:$0xff]  }
  0x69   :  { %1540 = vmatprep.mubr.bf16.mxu0 %v3834_v30  ;;  %1712 = vmatprep.mubr.bf16.mxu1 %v3834_v30  ;;  %v3876_v30 = vld [vmem:[#allocation2 + $0x4cc] ss:$16 sps:$4 sm:$0xff]  }
  0x6b   :  { %1511 = vmatpush1.bf16.msra.mxu0 %v3742_v8  ;;  %1683 = vmatpush1.bf16.msra.mxu1 %v3745_v9  ;;  %v3843_v8 = vld [vmem:[#allocation2 + $0x424] ss:$16 sps:$4 sm:$0xff]   ;;  %v3846_v9 = vld [vmem:[#allocation2 + $0x42c] ss:$16 sps:$4 sm:$0xff]  }
  0x6c   :  { %1512 = vmatprep.subr.bf16.mxu0 %v3750_v10  ;;  %1684 = vmatprep.subr.bf16.mxu1 %v3753_v11  ;;  %v3841_v10 = vld [vmem:[#allocation2 + $0x420] ss:$16 sps:$4 sm:$0xff]   ;;  %v3844_v11 = vld [vmem:[#allocation2 + $0x428] ss:$16 sps:$4 sm:$0xff]  }
  0x6f   :  { %1513 = vmatpush1.bf16.msra.mxu0 %v3748_v12  ;;  %1685 = vmatpush1.bf16.msra.mxu1 %v3751_v13  ;;  %v3933_v12 = vld [vmem:[%s4482_s0 + $0x14] ss:$28 sps:$4 sm:$0xff]  }
  0x70   :  { %1514 = vmatprep.subr.bf16.mxu0 %v3756_v14  ;;  %1686 = vmatprep.subr.bf16.mxu1 %v3759_v15  ;;  %v3849_v13 = vld [vmem:[#allocation2 + $0x444] ss:$16 sps:$4 sm:$0xff]   ;;  %v3852_v14 = vld [vmem:[#allocation2 + $0x44c] ss:$16 sps:$4 sm:$0xff]   ;;  %v3847_v15 = vld [vmem:[#allocation2 + $0x440] ss:$16 sps:$4 sm:$0xff]  }
  0x73   :  { %1515 = vmatpush1.bf16.msra.mxu0 %v3754_v16  ;;  %1687 = vmatpush1.bf16.msra.mxu1 %v3757_v17  ;;  %v3850_v16 = vld [vmem:[#allocation2 + $0x448] ss:$16 sps:$4 sm:$0xff]   ;;  %v3855_v17 = vld [vmem:[#allocation2 + $0x464] ss:$16 sps:$4 sm:$0xff]  }
  0x74   :  { %1516 = vmatprep.subr.bf16.mxu0 %v3762_v18  ;;  %1688 = vmatprep.subr.bf16.mxu1 %v3765_v19  ;;  %v3858_v18 = vld [vmem:[#allocation2 + $0x46c] ss:$16 sps:$4 sm:$0xff]   ;;  %v3853_v19 = vld [vmem:[#allocation2 + $0x460] ss:$16 sps:$4 sm:$0xff]  }
  0x77   :  { %1517 = vmatpush1.bf16.msra.mxu0 %v3760_v20  ;;  %1689 = vmatpush1.bf16.msra.mxu1 %v3763_v21  ;;  %v3856_v20 = vld [vmem:[#allocation2 + $0x468] ss:$16 sps:$4 sm:$0xff]   ;;  %v3861_v21 = vld [vmem:[#allocation2 + $0x484] ss:$16 sps:$4 sm:$0xff]  }
  0x78   :  { %1518 = vmatprep.subr.bf16.mxu0 %v3768_v22  ;;  %1690 = vmatprep.subr.bf16.mxu1 %v3771_v23  ;;  %v3864_v22 = vld [vmem:[#allocation2 + $0x48c] ss:$16 sps:$4 sm:$0xff]   ;;  %v3859_v23 = vld [vmem:[#allocation2 + $0x480] ss:$16 sps:$4 sm:$0xff]  }
  0x7b   :  { %1519 = vmatpush1.bf16.msra.mxu0 %v3766_v24  ;;  %1691 = vmatpush1.bf16.msra.mxu1 %v3769_v25  ;;  %v3862_v24 = vld [vmem:[#allocation2 + $0x488] ss:$16 sps:$4 sm:$0xff]   ;;  %v3867_v25 = vld [vmem:[#allocation2 + $0x4a4] ss:$16 sps:$4 sm:$0xff]  }
  0x7c   :  { %1520 = vmatprep.subr.bf16.mxu0 %v3774_v26  ;;  %1692 = vmatprep.subr.bf16.mxu1 %v3777_v27  ;;  %v3870_v26 = vld [vmem:[#allocation2 + $0x4ac] ss:$16 sps:$4 sm:$0xff]   ;;  %v3865_v27 = vld [vmem:[#allocation2 + $0x4a0] ss:$16 sps:$4 sm:$0xff]  }
  0x7f   :  { %1521 = vmatpush1.bf16.msra.mxu0 %v3772_v28  ;;  %1693 = vmatpush1.bf16.msra.mxu1 %v3775_v29  ;;  %v3868_v28 = vld [vmem:[#allocation2 + $0x4a8] ss:$16 sps:$4 sm:$0xff]   ;;  %v3873_v29 = vld [vmem:[#allocation2 + $0x4c4] ss:$16 sps:$4 sm:$0xff]  }
  0x80   :  { %1522 = vmatprep.subr.bf16.mxu0 %v3780_v31  ;;  %1694 = vmatprep.subr.bf16.mxu1 %v3783_v32  ;;  %v3871_v31 = vld [vmem:[#allocation2 + $0x4c0] ss:$16 sps:$4 sm:$0xff]   ;;  %v3874_v32 = vld [vmem:[#allocation2 + $0x4c8] ss:$16 sps:$4 sm:$0xff]  }
  0x83   :  { %1523 = vmatpush1.bf16.msra.mxu0 %v3778_v33  ;;  %1695 = vmatpush1.bf16.msra.mxu1 %v3781_v34  ;;  %v3879_v33 = vld [vmem:[#allocation2 + $0x4e4] ss:$16 sps:$4 sm:$0xff]   ;;  %v3882_v34 = vld [vmem:[#allocation2 + $0x4ec] ss:$16 sps:$4 sm:$0xff]  }
  0x84   :  { %1524 = vmatprep.subr.bf16.mxu0 %v3786_v35  ;;  %1696 = vmatprep.subr.bf16.mxu1 %v3789_v36  ;;  %v3877_v35 = vld [vmem:[#allocation2 + $0x4e0] ss:$16 sps:$4 sm:$0xff]   ;;  %v3880_v36 = vld [vmem:[#allocation2 + $0x4e8] ss:$16 sps:$4 sm:$0xff]  }
  0x87   :  { %1525 = vmatpush1.bf16.msra.mxu0 %v3784_v37  ;;  %1697 = vmatpush1.bf16.msra.mxu1 %v3787_v38  ;;  %v3885_v37 = vld [vmem:[#allocation2 + $0x504] ss:$16 sps:$4 sm:$0xff]   ;;  %v3888_v38 = vld [vmem:[#allocation2 + $0x50c] ss:$16 sps:$4 sm:$0xff]  }
  0x88   :  { %1526 = vmatprep.subr.bf16.mxu0 %v3792_v39  ;;  %1698 = vmatprep.subr.bf16.mxu1 %v3795_v40  ;;  %v3883_v39 = vld [vmem:[#allocation2 + $0x500] ss:$16 sps:$4 sm:$0xff]   ;;  %v3886_v40 = vld [vmem:[#allocation2 + $0x508] ss:$16 sps:$4 sm:$0xff]  }
  0x8b   :  { %1527 = vmatpush1.bf16.msra.mxu0 %v3790_v41  ;;  %1699 = vmatpush1.bf16.msra.mxu1 %v3793_v42  ;;  %v3891_v41 = vld [vmem:[#allocation2 + $0x524] ss:$16 sps:$4 sm:$0xff]   ;;  %v3894_v42 = vld [vmem:[#allocation2 + $0x52c] ss:$16 sps:$4 sm:$0xff]  }
  0x8c   :  { %1528 = vmatprep.subr.bf16.mxu0 %v3798_v43  ;;  %1700 = vmatprep.subr.bf16.mxu1 %v3801_v44  ;;  %v3889_v43 = vld [vmem:[#allocation2 + $0x520] ss:$16 sps:$4 sm:$0xff]   ;;  %v3892_v44 = vld [vmem:[#allocation2 + $0x528] ss:$16 sps:$4 sm:$0xff]  }
  0x8f   :  { %1529 = vmatpush1.bf16.msra.mxu0 %v3796_v45  ;;  %1701 = vmatpush1.bf16.msra.mxu1 %v3799_v46  ;;  %v3897_v45 = vld [vmem:[#allocation2 + $0x544] ss:$16 sps:$4 sm:$0xff]   ;;  %v3900_v46 = vld [vmem:[#allocation2 + $0x54c] ss:$16 sps:$4 sm:$0xff]  }
  0x90   :  { %1530 = vmatprep.subr.bf16.mxu0 %v3804_v47  ;;  %1702 = vmatprep.subr.bf16.mxu1 %v3807_v48  ;;  %v3895_v47 = vld [vmem:[#allocation2 + $0x540] ss:$16 sps:$4 sm:$0xff]   ;;  %v3898_v48 = vld [vmem:[#allocation2 + $0x548] ss:$16 sps:$4 sm:$0xff]  }
  0x93   :  { %1531 = vmatpush1.bf16.msra.mxu0 %v3802_v49  ;;  %1703 = vmatpush1.bf16.msra.mxu1 %v3805_v50  ;;  %v3903_v49 = vld [vmem:[#allocation2 + $0x564] ss:$16 sps:$4 sm:$0xff]   ;;  %v3906_v50 = vld [vmem:[#allocation2 + $0x56c] ss:$16 sps:$4 sm:$0xff]  }
  0x94   :  { %1532 = vmatprep.subr.bf16.mxu0 %v3810_v51  ;;  %1704 = vmatprep.subr.bf16.mxu1 %v3813_v52  ;;  %v3901_v51 = vld [vmem:[#allocation2 + $0x560] ss:$16 sps:$4 sm:$0xff]   ;;  %v3904_v52 = vld [vmem:[#allocation2 + $0x568] ss:$16 sps:$4 sm:$0xff]  }
  0x97   :  { %1533 = vmatpush1.bf16.msra.mxu0 %v3808_v53  ;;  %1705 = vmatpush1.bf16.msra.mxu1 %v3811_v54  ;;  %v3909_v53 = vld [vmem:[#allocation2 + $0x584] ss:$16 sps:$4 sm:$0xff]   ;;  %v3912_v54 = vld [vmem:[#allocation2 + $0x58c] ss:$16 sps:$4 sm:$0xff]  }
  0x98   :  { %1534 = vmatprep.subr.bf16.mxu0 %v3816_v55  ;;  %1706 = vmatprep.subr.bf16.mxu1 %v3819_v56  ;;  %v3907_v55 = vld [vmem:[#allocation2 + $0x580] ss:$16 sps:$4 sm:$0xff]   ;;  %v3910_v56 = vld [vmem:[#allocation2 + $0x588] ss:$16 sps:$4 sm:$0xff]  }
  0x9b   :  { %1535 = vmatpush1.bf16.msra.mxu0 %v3814_v57  ;;  %1707 = vmatpush1.bf16.msra.mxu1 %v3817_v58  ;;  %v3915_v57 = vld [vmem:[#allocation2 + $0x5a4] ss:$16 sps:$4 sm:$0xff]   ;;  %v3918_v58 = vld [vmem:[#allocation2 + $0x5ac] ss:$16 sps:$4 sm:$0xff]  }
  0x9c   :  { %1536 = vmatprep.subr.bf16.mxu0 %v3822_v59  ;;  %1708 = vmatprep.subr.bf16.mxu1 %v3825_v60  ;;  %v3913_v59 = vld [vmem:[#allocation2 + $0x5a0] ss:$16 sps:$4 sm:$0xff]   ;;  %v3916_v60 = vld [vmem:[#allocation2 + $0x5a8] ss:$16 sps:$4 sm:$0xff]  }
  0x9f   :  { %1537 = vmatpush1.bf16.msra.mxu0 %v3820_v61  ;;  %1709 = vmatpush1.bf16.msra.mxu1 %v3823_v62  ;;  %v3921_v61 = vld [vmem:[#allocation2 + $0x5c4] ss:$16 sps:$4 sm:$0xff]   ;;  %v3924_v62 = vld [vmem:[#allocation2 + $0x5cc] ss:$16 sps:$4 sm:$0xff]  }
  0xa0   :  { %1538 = vmatprep.subr.bf16.mxu0 %v3828_v63  ;;  %1710 = vmatprep.subr.bf16.mxu1 %v3831_v0  ;;  %v3919_v63 = vld [vmem:[#allocation2 + $0x5c0] ss:$16 sps:$4 sm:$0xff]   ;;  %v3922_v0 = vld [vmem:[#allocation2 + $0x5c8] ss:$16 sps:$4 sm:$0xff]  }
  0xa3   :  { %1539 = vmatpush1.bf16.msra.mxu0 %v3826_v1  ;;  %1711 = vmatpush1.bf16.msra.mxu1 %v3829_v2  ;;  %v3927_v1 = vld [vmem:[#allocation2 + $0x5e4] ss:$16 sps:$4 sm:$0xff]   ;;  %v3930_v2 = vld [vmem:[#allocation2 + $0x5ec] ss:$16 sps:$4 sm:$0xff]  }
  0xa4   :  { %1551 = vmatprep.subr.bf16.mxu0 %v3837_v3  ;;  %1723 = vmatprep.subr.bf16.mxu1 %v3840_v4  ;;  %v3925_v3 = vld [vmem:[#allocation2 + $0x5e0] ss:$16 sps:$4 sm:$0xff]   ;;  %v3928_v4 = vld [vmem:[#allocation2 + $0x5e8] ss:$16 sps:$4 sm:$0xff]  }
  0xa6   :  { %1541 = vmatmul.mubr.bf16.vlgmr.msra.gmra.mrb[0].mxu0 %v3832_v5  ;;  %1713 = vmatmul.mubr.bf16.vlgmr.msra.gmra.mrb[0].mxu1 %v3832_v5  ;;  %v3936_v5 = vld [vmem:[#allocation2 + $0x604] ss:$16 sps:$4 sm:$0xff]  }
  0xa7   :  { %1552 = vmatpush1.bf16.msra.mxu0 %v3835_v6  ;;  %1724 = vmatpush1.bf16.msra.mxu1 %v3838_v7  ;;  %v3931_v6 = vld [vmem:[%s4482_s0 + $0x10] ss:$28 sps:$4 sm:$0xff]  }
  0xa8   :  { %1553 = vmatprep.subr.bf16.mxu0 %v3843_v8  ;;  %1725 = vmatprep.subr.bf16.mxu1 %v3846_v9  ;;  %v3939_v7 = vld [vmem:[#allocation2 + $0x60c] ss:$16 sps:$4 sm:$0xff]   ;;  %v3934_v8 = vld [vmem:[#allocation2 + $0x600] ss:$16 sps:$4 sm:$0xff]   ;;  %v3937_v9 = vld [vmem:[#allocation2 + $0x608] ss:$16 sps:$4 sm:$0xff]  }
  0xa9   :  { %1583 = vmatprep.mubr.bf16.mxu0 %v3933_v12  ;;  %1755 = vmatprep.mubr.bf16.mxu1 %v3933_v12  ;;  %v3940_v12 = vld [vmem:[#allocation2 + $0x620] ss:$16 sps:$4 sm:$0xff]  }
  0xab   :  { %1554 = vmatpush1.bf16.msra.mxu0 %v3841_v10  ;;  %1726 = vmatpush1.bf16.msra.mxu1 %v3844_v11  ;;  %v3942_v10 = vld [vmem:[#allocation2 + $0x624] ss:$16 sps:$4 sm:$0xff]   ;;  %v3945_v11 = vld [vmem:[#allocation2 + $0x62c] ss:$16 sps:$4 sm:$0xff]  }
  0xac   :  { %1555 = vmatprep.subr.bf16.mxu0 %v3849_v13  ;;  %1727 = vmatprep.subr.bf16.mxu1 %v3852_v14  ;;  %v3943_v13 = vld [vmem:[#allocation2 + $0x628] ss:$16 sps:$4 sm:$0xff]   ;;  %v3948_v14 = vld [vmem:[#allocation2 + $0x644] ss:$16 sps:$4 sm:$0xff]  }
  0xaf   :  { %1556 = vmatpush1.bf16.msra.mxu0 %v3847_v15  ;;  %1728 = vmatpush1.bf16.msra.mxu1 %v3850_v16  ;;  %v3951_v15 = vld [vmem:[#allocation2 + $0x64c] ss:$16 sps:$4 sm:$0xff]   ;;  %v3946_v16 = vld [vmem:[#allocation2 + $0x640] ss:$16 sps:$4 sm:$0xff]  }
  0xb0   :  { %1557 = vmatprep.subr.bf16.mxu0 %v3855_v17  ;;  %1729 = vmatprep.subr.bf16.mxu1 %v3858_v18  ;;  %v3949_v17 = vld [vmem:[#allocation2 + $0x648] ss:$16 sps:$4 sm:$0xff]   ;;  %v4259_v18 = vmov 0  }
  0xb3   :  { %1558 = vmatpush1.bf16.msra.mxu0 %v3853_v19  ;;  %1730 = vmatpush1.bf16.msra.mxu1 %v3856_v20  ;;  %v3954_v19 = vld [vmem:[#allocation2 + $0x664] ss:$16 sps:$4 sm:$0xff]   ;;  %v3957_v20 = vld [vmem:[#allocation2 + $0x66c] ss:$16 sps:$4 sm:$0xff]  }
  0xb4   :  { %1559 = vmatprep.subr.bf16.mxu0 %v3861_v21  ;;  %1731 = vmatprep.subr.bf16.mxu1 %v3864_v22  ;;  %v3952_v21 = vld [vmem:[#allocation2 + $0x660] ss:$16 sps:$4 sm:$0xff]   ;;  %v3955_v22 = vld [vmem:[#allocation2 + $0x668] ss:$16 sps:$4 sm:$0xff]  }
  0xb7   :  { %1560 = vmatpush1.bf16.msra.mxu0 %v3859_v23  ;;  %1732 = vmatpush1.bf16.msra.mxu1 %v3862_v24  ;;  %v3960_v23 = vld [vmem:[#allocation2 + $0x684] ss:$16 sps:$4 sm:$0xff]   ;;  %v3963_v24 = vld [vmem:[#allocation2 + $0x68c] ss:$16 sps:$4 sm:$0xff]  }
  0xb8   :  { %1561 = vmatprep.subr.bf16.mxu0 %v3867_v25  ;;  %1733 = vmatprep.subr.bf16.mxu1 %v3870_v26  ;;  %v3958_v25 = vld [vmem:[#allocation2 + $0x680] ss:$16 sps:$4 sm:$0xff]   ;;  %v3961_v26 = vld [vmem:[#allocation2 + $0x688] ss:$16 sps:$4 sm:$0xff]  }
  0xbb   :  { %1562 = vmatpush1.bf16.msra.mxu0 %v3865_v27  ;;  %1734 = vmatpush1.bf16.msra.mxu1 %v3868_v28  ;;  %v3966_v27 = vld [vmem:[#allocation2 + $0x6a4] ss:$16 sps:$4 sm:$0xff]   ;;  %v3969_v28 = vld [vmem:[#allocation2 + $0x6ac] ss:$16 sps:$4 sm:$0xff]  }
  0xbc   :  { %1563 = vmatprep.subr.bf16.mxu0 %v3873_v29  ;;  %1735 = vmatprep.subr.bf16.mxu1 %v3876_v30  ;;  %v3964_v29 = vld [vmem:[#allocation2 + $0x6a0] ss:$16 sps:$4 sm:$0xff]   ;;  %v3967_v30 = vld [vmem:[#allocation2 + $0x6a8] ss:$16 sps:$4 sm:$0xff]  }
  0xbf   :  { %1564 = vmatpush1.bf16.msra.mxu0 %v3871_v31  ;;  %1736 = vmatpush1.bf16.msra.mxu1 %v3874_v32  ;;  %v3972_v31 = vld [vmem:[#allocation2 + $0x6c4] ss:$16 sps:$4 sm:$0xff]   ;;  %v3975_v32 = vld [vmem:[#allocation2 + $0x6cc] ss:$16 sps:$4 sm:$0xff]  }
  0xc0   :  { %1565 = vmatprep.subr.bf16.mxu0 %v3879_v33  ;;  %1737 = vmatprep.subr.bf16.mxu1 %v3882_v34  ;;  %v3970_v33 = vld [vmem:[#allocation2 + $0x6c0] ss:$16 sps:$4 sm:$0xff]   ;;  %v3973_v34 = vld [vmem:[#allocation2 + $0x6c8] ss:$16 sps:$4 sm:$0xff]  }
  0xc3   :  { %1566 = vmatpush1.bf16.msra.mxu0 %v3877_v35  ;;  %1738 = vmatpush1.bf16.msra.mxu1 %v3880_v36  ;;  %v3978_v35 = vld [vmem:[#allocation2 + $0x6e4] ss:$16 sps:$4 sm:$0xff]   ;;  %v3981_v36 = vld [vmem:[#allocation2 + $0x6ec] ss:$16 sps:$4 sm:$0xff]  }
  0xc4   :  { %1567 = vmatprep.subr.bf16.mxu0 %v3885_v37  ;;  %1739 = vmatprep.subr.bf16.mxu1 %v3888_v38  ;;  %v3976_v37 = vld [vmem:[#allocation2 + $0x6e0] ss:$16 sps:$4 sm:$0xff]   ;;  %v3979_v38 = vld [vmem:[#allocation2 + $0x6e8] ss:$16 sps:$4 sm:$0xff]  }
  0xc7   :  { %1568 = vmatpush1.bf16.msra.mxu0 %v3883_v39  ;;  %1740 = vmatpush1.bf16.msra.mxu1 %v3886_v40  ;;  %v3985_v39 = vld [vmem:[#allocation4 + $0x4] ss:$16 sps:$4 sm:$0xff]   ;;  %v3988_v40 = vld [vmem:[#allocation4 + $0xc] ss:$16 sps:$4 sm:$0xff]  }
  0xc8   :  { %1569 = vmatprep.subr.bf16.mxu0 %v3891_v41  ;;  %1741 = vmatprep.subr.bf16.mxu1 %v3894_v42  ;;  %v3982_v41 = vld [vmem:[%s4482_s0 + $0x18] ss:$28 sps:$4 sm:$0xff]   ;;  %v3983_v42 = vld [vmem:[#allocation4] ss:$16 sps:$4 sm:$0xff]  }
  0xcb   :  { %1570 = vmatpush1.bf16.msra.mxu0 %v3889_v43  ;;  %1742 = vmatpush1.bf16.msra.mxu1 %v3892_v44  ;;  %v3986_v43 = vld [vmem:[#allocation4 + $0x8] ss:$16 sps:$4 sm:$0xff]   ;;  %v3991_v44 = vld [vmem:[#allocation4 + $0x24] ss:$16 sps:$4 sm:$0xff]  }
  0xcc   :  { %1571 = vmatprep.subr.bf16.mxu0 %v3897_v45  ;;  %1743 = vmatprep.subr.bf16.mxu1 %v3900_v46  ;;  %v3994_v45 = vld [vmem:[#allocation4 + $0x2c] ss:$16 sps:$4 sm:$0xff]   ;;  %v3989_v46 = vld [vmem:[#allocation4 + $0x20] ss:$16 sps:$4 sm:$0xff]  }
  0xcf   :  { %1572 = vmatpush1.bf16.msra.mxu0 %v3895_v47  ;;  %1744 = vmatpush1.bf16.msra.mxu1 %v3898_v48  ;;  %v3992_v47 = vld [vmem:[#allocation4 + $0x28] ss:$16 sps:$4 sm:$0xff]   ;;  %v3997_v48 = vld [vmem:[#allocation4 + $0x44] ss:$16 sps:$4 sm:$0xff]  }
  0xd0   :  { %1573 = vmatprep.subr.bf16.mxu0 %v3903_v49  ;;  %1745 = vmatprep.subr.bf16.mxu1 %v3906_v50  ;;  %v4000_v49 = vld [vmem:[#allocation4 + $0x4c] ss:$16 sps:$4 sm:$0xff]   ;;  %v3995_v50 = vld [vmem:[#allocation4 + $0x40] ss:$16 sps:$4 sm:$0xff]  }
  0xd3   :  { %1574 = vmatpush1.bf16.msra.mxu0 %v3901_v51  ;;  %1746 = vmatpush1.bf16.msra.mxu1 %v3904_v52  ;;  %v3998_v51 = vld [vmem:[#allocation4 + $0x48] ss:$16 sps:$4 sm:$0xff]   ;;  %v4003_v52 = vld [vmem:[#allocation4 + $0x64] ss:$16 sps:$4 sm:$0xff]  }
  0xd4   :  { %1575 = vmatprep.subr.bf16.mxu0 %v3909_v53  ;;  %1747 = vmatprep.subr.bf16.mxu1 %v3912_v54  ;;  %v4006_v53 = vld [vmem:[#allocation4 + $0x6c] ss:$16 sps:$4 sm:$0xff]   ;;  %v4001_v54 = vld [vmem:[#allocation4 + $0x60] ss:$16 sps:$4 sm:$0xff]  }
  0xd7   :  { %1576 = vmatpush1.bf16.msra.mxu0 %v3907_v55  ;;  %1748 = vmatpush1.bf16.msra.mxu1 %v3910_v56  ;;  %v4004_v55 = vld [vmem:[#allocation4 + $0x68] ss:$16 sps:$4 sm:$0xff]   ;;  %v4009_v56 = vld [vmem:[#allocation4 + $0x84] ss:$16 sps:$4 sm:$0xff]  }
  0xd8   :  { %1577 = vmatprep.subr.bf16.mxu0 %v3915_v57  ;;  %1749 = vmatprep.subr.bf16.mxu1 %v3918_v58  ;;  %v4012_v57 = vld [vmem:[#allocation4 + $0x8c] ss:$16 sps:$4 sm:$0xff]   ;;  %v4007_v58 = vld [vmem:[#allocation4 + $0x80] ss:$16 sps:$4 sm:$0xff]  }
  0xdb   :  { %1578 = vmatpush1.bf16.msra.mxu0 %v3913_v59  ;;  %1750 = vmatpush1.bf16.msra.mxu1 %v3916_v60  ;;  %v4010_v59 = vld [vmem:[#allocation4 + $0x88] ss:$16 sps:$4 sm:$0xff]   ;;  %v4015_v60 = vld [vmem:[#allocation4 + $0xa4] ss:$16 sps:$4 sm:$0xff]  }
  0xdc   :  { %1579 = vmatprep.subr.bf16.mxu0 %v3921_v61  ;;  %1751 = vmatprep.subr.bf16.mxu1 %v3924_v62  ;;  %v4018_v61 = vld [vmem:[#allocation4 + $0xac] ss:$16 sps:$4 sm:$0xff]   ;;  %v4013_v62 = vld [vmem:[#allocation4 + $0xa0] ss:$16 sps:$4 sm:$0xff]  }
  0xdf   :  { %1580 = vmatpush1.bf16.msra.mxu0 %v3919_v63  ;;  %1752 = vmatpush1.bf16.msra.mxu1 %v3922_v0  ;;  %v4016_v63 = vld [vmem:[#allocation4 + $0xa8] ss:$16 sps:$4 sm:$0xff]   ;;  %v4021_v0 = vld [vmem:[#allocation4 + $0xc4] ss:$16 sps:$4 sm:$0xff]  }
  0xe0   :  { %1581 = vmatprep.subr.bf16.mxu0 %v3927_v1  ;;  %1753 = vmatprep.subr.bf16.mxu1 %v3930_v2  ;;  %v4024_v1 = vld [vmem:[#allocation4 + $0xcc] ss:$16 sps:$4 sm:$0xff]   ;;  %v4019_v2 = vld [vmem:[#allocation4 + $0xc0] ss:$16 sps:$4 sm:$0xff]  }
  0xe3   :  { %1582 = vmatpush1.bf16.msra.mxu0 %v3925_v3  ;;  %1754 = vmatpush1.bf16.msra.mxu1 %v3928_v4  ;;  %v4022_v3 = vld [vmem:[#allocation4 + $0xc8] ss:$16 sps:$4 sm:$0xff]   ;;  %v4027_v4 = vld [vmem:[#allocation4 + $0xe4] ss:$16 sps:$4 sm:$0xff]  }
  0xe4   :  { %1594 = vmatprep.subr.bf16.mxu0 %v3936_v5  ;;  %1766 = vmatprep.subr.bf16.mxu1 %v3939_v7  ;;  %v4030_v5 = vld [vmem:[#allocation4 + $0xec] ss:$16 sps:$4 sm:$0xff]   ;;  %v4028_v7 = vld [vmem:[#allocation4 + $0xe8] ss:$16 sps:$4 sm:$0xff]  }
  0xe6   :  { %1584 = vmatmul.mubr.bf16.vlgmr.msra.gmra.mrb[0].mxu0 %v3931_v6  ;;  %1756 = vmatmul.mubr.bf16.vlgmr.msra.gmra.mrb[0].mxu1 %v3931_v6  ;;  %v4025_v6 = vld [vmem:[#allocation4 + $0xe0] ss:$16 sps:$4 sm:$0xff]  }
  0xe7   :  { %1595 = vmatpush1.bf16.msra.mxu0 %v3934_v8  ;;  %1767 = vmatpush1.bf16.msra.mxu1 %v3937_v9  ;;  %v4033_v8 = vld [vmem:[#allocation4 + $0x104] ss:$16 sps:$4 sm:$0xff]   ;;  %v4036_v9 = vld [vmem:[#allocation4 + $0x10c] ss:$16 sps:$4 sm:$0xff]  }
  0xe8   :  { %1596 = vmatprep.subr.bf16.mxu0 %v3942_v10  ;;  %1768 = vmatprep.subr.bf16.mxu1 %v3945_v11  ;;  %v4031_v10 = vld [vmem:[#allocation4 + $0x100] ss:$16 sps:$4 sm:$0xff]   ;;  %v4034_v11 = vld [vmem:[#allocation4 + $0x108] ss:$16 sps:$4 sm:$0xff]  }
  0xe9   :  { %1626 = vmatprep.mubr.bf16.mxu0 %v4259_v18  ;;  %1798 = vmatprep.mubr.bf16.mxu1 %v4259_v18  ;;  %v4043_v18 = vld [vmem:[#allocation4 + $0x140] ss:$16 sps:$4 sm:$0xff]  }
  0xeb   :  { %1597 = vmatpush1.bf16.msra.mxu0 %v3940_v12  ;;  %1769 = vmatpush1.bf16.msra.mxu1 %v3943_v13  ;;  %v4039_v12 = vld [vmem:[#allocation4 + $0x124] ss:$16 sps:$4 sm:$0xff]   ;;  %v4042_v13 = vld [vmem:[#allocation4 + $0x12c] ss:$16 sps:$4 sm:$0xff]  }
  0xec   :  { %1598 = vmatprep.subr.bf16.mxu0 %v3948_v14  ;;  %1770 = vmatprep.subr.bf16.mxu1 %v3951_v15  ;;  %v4037_v14 = vld [vmem:[#allocation4 + $0x120] ss:$16 sps:$4 sm:$0xff]   ;;  %v4040_v15 = vld [vmem:[#allocation4 + $0x128] ss:$16 sps:$4 sm:$0xff]  }
  0xef   :  { %1599 = vmatpush1.bf16.msra.mxu0 %v3946_v16  ;;  %1771 = vmatpush1.bf16.msra.mxu1 %v3949_v17  ;;  %v4045_v16 = vld [vmem:[#allocation4 + $0x144] ss:$16 sps:$4 sm:$0xff]   ;;  %v4048_v17 = vld [vmem:[#allocation4 + $0x14c] ss:$16 sps:$4 sm:$0xff]  }
  0xf0   :  { %1600 = vmatprep.subr.bf16.mxu0 %v3954_v19  ;;  %1772 = vmatprep.subr.bf16.mxu1 %v3957_v20  ;;  %v4046_v19 = vld [vmem:[#allocation4 + $0x148] ss:$16 sps:$4 sm:$0xff]   ;;  %v4051_v20 = vld [vmem:[#allocation4 + $0x164] ss:$16 sps:$4 sm:$0xff]  }
  0xf3   :  { %1601 = vmatpush1.bf16.msra.mxu0 %v3952_v21  ;;  %1773 = vmatpush1.bf16.msra.mxu1 %v3955_v22  ;;  %v4054_v21 = vld [vmem:[#allocation4 + $0x16c] ss:$16 sps:$4 sm:$0xff]   ;;  %v4049_v22 = vld [vmem:[#allocation4 + $0x160] ss:$16 sps:$4 sm:$0xff]  }
  0xf4   :  { %1602 = vmatprep.subr.bf16.mxu0 %v3960_v23  ;;  %1774 = vmatprep.subr.bf16.mxu1 %v3963_v24  ;;  %v4052_v23 = vld [vmem:[#allocation4 + $0x168] ss:$16 sps:$4 sm:$0xff]   ;;  %v4057_v24 = vld [vmem:[#allocation4 + $0x184] ss:$16 sps:$4 sm:$0xff]  }
  0xf7   :  { %1603 = vmatpush1.bf16.msra.mxu0 %v3958_v25  ;;  %1775 = vmatpush1.bf16.msra.mxu1 %v3961_v26  ;;  %v4060_v25 = vld [vmem:[#allocation4 + $0x18c] ss:$16 sps:$4 sm:$0xff]   ;;  %v4055_v26 = vld [vmem:[#allocation4 + $0x180] ss:$16 sps:$4 sm:$0xff]  }
  0xf8   :  { %1604 = vmatprep.subr.bf16.mxu0 %v3966_v27  ;;  %1776 = vmatprep.subr.bf16.mxu1 %v3969_v28  ;;  %v4058_v27 = vld [vmem:[#allocation4 + $0x188] ss:$16 sps:$4 sm:$0xff]   ;;  %v4063_v28 = vld [vmem:[#allocation4 + $0x1a4] ss:$16 sps:$4 sm:$0xff]  }
  0xfb   :  { %1605 = vmatpush1.bf16.msra.mxu0 %v3964_v29  ;;  %1777 = vmatpush1.bf16.msra.mxu1 %v3967_v30  ;;  %v4066_v29 = vld [vmem:[#allocation4 + $0x1ac] ss:$16 sps:$4 sm:$0xff]   ;;  %v4061_v30 = vld [vmem:[#allocation4 + $0x1a0] ss:$16 sps:$4 sm:$0xff]  }
  0xfc   :  { %1606 = vmatprep.subr.bf16.mxu0 %v3972_v31  ;;  %1778 = vmatprep.subr.bf16.mxu1 %v3975_v32  ;;  %v4064_v31 = vld [vmem:[#allocation4 + $0x1a8] ss:$16 sps:$4 sm:$0xff]   ;;  %v4069_v32 = vld [vmem:[#allocation4 + $0x1c4] ss:$16 sps:$4 sm:$0xff]  }
  0xff   :  { %1607 = vmatpush1.bf16.msra.mxu0 %v3970_v33  ;;  %1779 = vmatpush1.bf16.msra.mxu1 %v3973_v34  ;;  %v4072_v33 = vld [vmem:[#allocation4 + $0x1cc] ss:$16 sps:$4 sm:$0xff]   ;;  %v4067_v34 = vld [vmem:[#allocation4 + $0x1c0] ss:$16 sps:$4 sm:$0xff]  }
 0x100   :  { %1608 = vmatprep.subr.bf16.mxu0 %v3978_v35  ;;  %1780 = vmatprep.subr.bf16.mxu1 %v3981_v36  ;;  %v4070_v35 = vld [vmem:[#allocation4 + $0x1c8] ss:$16 sps:$4 sm:$0xff]   ;;  %v4075_v36 = vld [vmem:[#allocation4 + $0x1e4] ss:$16 sps:$4 sm:$0xff]  }
 0x103   :  { %1609 = vmatpush1.bf16.msra.mxu0 %v3976_v37  ;;  %1781 = vmatpush1.bf16.msra.mxu1 %v3979_v38  ;;  %v4078_v37 = vld [vmem:[#allocation4 + $0x1ec] ss:$16 sps:$4 sm:$0xff]   ;;  %v4073_v38 = vld [vmem:[#allocation4 + $0x1e0] ss:$16 sps:$4 sm:$0xff]  }
 0x104   :  { %2611 = vmatprep.subr.bf16.mxu0 %v3985_v39  ;;  %2697 = vmatprep.subr.bf16.mxu1 %v3988_v40  ;;  %v4076_v39 = vld [vmem:[#allocation4 + $0x1e8] ss:$16 sps:$4 sm:$0xff]   ;;  %v4081_v40 = vld [vmem:[#allocation4 + $0x204] ss:$16 sps:$4 sm:$0xff]  }
 0x106   :  { %1627 = vmatmul.mubr.bf16.vlgmr.msra.gmra.mrb[0].mxu0 %v3982_v41  ;;  %1799 = vmatmul.mubr.bf16.vlgmr.msra.gmra.mrb[0].mxu1 %v3982_v41  ;;  %v4084_v41 = vld [vmem:[#allocation4 + $0x20c] ss:$16 sps:$4 sm:$0xff]  }
 0x107   :  { %2612 = vmatpush1.bf16.msra.mxu0 %v3983_v42  ;;  %2698 = vmatpush1.bf16.msra.mxu1 %v3986_v43  ;;  %v289_v42 = vlaneseq }
 0x108   :  { %2613 = vmatprep.subr.bf16.mxu0 %v3991_v44  ;;  %2699 = vmatprep.subr.bf16.mxu1 %v3994_v45 }
 0x109   :  { %v4345_v43 = vshrl.u32 %v289_v42, 7  ;;  %v4118_v42 = vld [vmem:[#allocation4 + $0x2c8] ss:$16 sps:$4 sm:$0xff]  }
 0x10b   :  { %2614 = vmatpush1.bf16.msra.mxu0 %v3989_v46  ;;  %2700 = vmatpush1.bf16.msra.mxu1 %v3992_v47  ;;  %v291_v44 = vsub.s32 0, %v4345_v43  ;;  %v299_v45 = vsub.s32 2, %v4345_v43  ;;  %v287_v46 = vld [vmem:[%s4484_s2] sm:$0xf]  ;;  %v295_v47 = vsub.s32 1, %v4345_v43 }
 0x10c   :  { %2615 = vmatprep.subr.bf16.mxu0 %v3997_v48  ;;  %2701 = vmatprep.subr.bf16.mxu1 %v4000_v49  ;;  %v303_v48 = vsub.s32 3, %v4345_v43 }
 0x10d   :  { %v292_v49 = vrot.slane %v287_v46, %v291_v44 }
 0x10f   :  { %2616 = vmatpush1.bf16.msra.mxu0 %v3995_v50  ;;  %2702 = vmatpush1.bf16.msra.mxu1 %v3998_v51  ;;  %v300_v50 = vrot.slane %v287_v46, %v299_v45  ;;  %v296_v51 = vrot.slane %v287_v46, %v295_v47 }
 0x110   :  { %2617 = vmatprep.subr.bf16.mxu0 %v4003_v52  ;;  %2703 = vmatprep.subr.bf16.mxu1 %v4006_v53  ;;  %v304_v52 = vrot.slane %v287_v46, %v303_v48  ;;  %v4123_v46 = vld [vmem:[#allocation4 + $0x2e4] ss:$16 sps:$4 sm:$0xff]  }
 0x113   :  { %2618 = vmatpush1.bf16.msra.mxu0 %v4001_v54  ;;  %2704 = vmatpush1.bf16.msra.mxu1 %v4004_v55 }
 0x114   :  { %2619 = vmatprep.subr.bf16.mxu0 %v4009_v56  ;;  %2705 = vmatprep.subr.bf16.mxu1 %v4012_v57 }
 0x117   :  { %2620 = vmatpush1.bf16.msra.mxu0 %v4007_v58  ;;  %2706 = vmatpush1.bf16.msra.mxu1 %v4010_v59 }
 0x118   :  { %2621 = vmatprep.subr.bf16.mxu0 %v4015_v60  ;;  %2707 = vmatprep.subr.bf16.mxu1 %v4018_v61 }
 0x11b   :  { %2622 = vmatpush1.bf16.msra.mxu0 %v4013_v62  ;;  %2708 = vmatpush1.bf16.msra.mxu1 %v4016_v63 }
 0x11c   :  { %2623 = vmatprep.subr.bf16.mxu0 %v4021_v0  ;;  %2709 = vmatprep.subr.bf16.mxu1 %v4024_v1 }
 0x11f   :  { %2624 = vmatpush1.bf16.msra.mxu0 %v4019_v2  ;;  %2710 = vmatpush1.bf16.msra.mxu1 %v4022_v3 }
 0x120   :  { %2625 = vmatprep.subr.bf16.mxu0 %v4027_v4  ;;  %2711 = vmatprep.subr.bf16.mxu1 %v4030_v5 }
 0x123   :  { %2626 = vmatpush1.bf16.msra.mxu0 %v4025_v6  ;;  %2712 = vmatpush1.bf16.msra.mxu1 %v4028_v7 }
 0x124   :  { %2627 = vmatprep.subr.bf16.mxu0 %v4033_v8  ;;  %2713 = vmatprep.subr.bf16.mxu1 %v4036_v9 }
 0x127   :  { %2628 = vmatpush1.bf16.msra.mxu0 %v4031_v10  ;;  %2714 = vmatpush1.bf16.msra.mxu1 %v4034_v11 }
 0x128   :  { %2629 = vmatprep.subr.bf16.mxu0 %v4039_v12  ;;  %2715 = vmatprep.subr.bf16.mxu1 %v4042_v13 }
 0x12b   :  { %2630 = vmatpush1.bf16.msra.mxu0 %v4037_v14  ;;  %2716 = vmatpush1.bf16.msra.mxu1 %v4040_v15 }
 0x12c   :  { %2631 = vmatprep.subr.bf16.mxu0 %v4045_v16  ;;  %2717 = vmatprep.subr.bf16.mxu1 %v4048_v17  ;;  %v4079_v17 = vld [vmem:[#allocation4 + $0x200] ss:$16 sps:$4 sm:$0xff]  }
 0x12f   :  { %2632 = vmatpush1.bf16.msra.mxu0 %v4043_v18  ;;  %2718 = vmatpush1.bf16.msra.mxu1 %v4046_v19  ;;  %v4082_v18 = vld [vmem:[#allocation4 + $0x208] ss:$16 sps:$4 sm:$0xff]   ;;  %v4087_v19 = vld [vmem:[#allocation4 + $0x224] ss:$16 sps:$4 sm:$0xff]  }
 0x130   :  { %2633 = vmatprep.subr.bf16.mxu0 %v4051_v20  ;;  %2719 = vmatprep.subr.bf16.mxu1 %v4054_v21  ;;  %v4090_v20 = vld [vmem:[#allocation4 + $0x22c] ss:$16 sps:$4 sm:$0xff]   ;;  %v4085_v21 = vld [vmem:[#allocation4 + $0x220] ss:$16 sps:$4 sm:$0xff]  }
 0x133   :  { %2634 = vmatpush1.bf16.msra.mxu0 %v4049_v22  ;;  %2720 = vmatpush1.bf16.msra.mxu1 %v4052_v23  ;;  %v4088_v22 = vld [vmem:[#allocation4 + $0x228] ss:$16 sps:$4 sm:$0xff]   ;;  %v4093_v23 = vld [vmem:[#allocation4 + $0x244] ss:$16 sps:$4 sm:$0xff]  }
 0x134   :  { %2635 = vmatprep.subr.bf16.mxu0 %v4057_v24  ;;  %2721 = vmatprep.subr.bf16.mxu1 %v4060_v25  ;;  %v4096_v24 = vld [vmem:[#allocation4 + $0x24c] ss:$16 sps:$4 sm:$0xff]   ;;  %v4091_v25 = vld [vmem:[#allocation4 + $0x240] ss:$16 sps:$4 sm:$0xff]  }
 0x137   :  { %2636 = vmatpush1.bf16.msra.mxu0 %v4055_v26  ;;  %2722 = vmatpush1.bf16.msra.mxu1 %v4058_v27  ;;  %v4094_v26 = vld [vmem:[#allocation4 + $0x248] ss:$16 sps:$4 sm:$0xff]   ;;  %v4099_v27 = vld [vmem:[#allocation4 + $0x264] ss:$16 sps:$4 sm:$0xff]  }
 0x138   :  { %2637 = vmatprep.subr.bf16.mxu0 %v4063_v28  ;;  %2723 = vmatprep.subr.bf16.mxu1 %v4066_v29  ;;  %v4102_v28 = vld [vmem:[#allocation4 + $0x26c] ss:$16 sps:$4 sm:$0xff]   ;;  %v4097_v29 = vld [vmem:[#allocation4 + $0x260] ss:$16 sps:$4 sm:$0xff]  }
 0x13b   :  { %2638 = vmatpush1.bf16.msra.mxu0 %v4061_v30  ;;  %2724 = vmatpush1.bf16.msra.mxu1 %v4064_v31  ;;  %v4100_v30 = vld [vmem:[#allocation4 + $0x268] ss:$16 sps:$4 sm:$0xff]   ;;  %v4105_v31 = vld [vmem:[#allocation4 + $0x284] ss:$16 sps:$4 sm:$0xff]  }
 0x13c   :  { %2639 = vmatprep.subr.bf16.mxu0 %v4069_v32  ;;  %2725 = vmatprep.subr.bf16.mxu1 %v4072_v33  ;;  %v4108_v32 = vld [vmem:[#allocation4 + $0x28c] ss:$16 sps:$4 sm:$0xff]   ;;  %v4103_v33 = vld [vmem:[#allocation4 + $0x280] ss:$16 sps:$4 sm:$0xff]  }
 0x13f   :  { %2640 = vmatpush1.bf16.msra.mxu0 %v4067_v34  ;;  %2726 = vmatpush1.bf16.msra.mxu1 %v4070_v35  ;;  %v4106_v34 = vld [vmem:[#allocation4 + $0x288] ss:$16 sps:$4 sm:$0xff]   ;;  %v4111_v35 = vld [vmem:[#allocation4 + $0x2a4] ss:$16 sps:$4 sm:$0xff]  }
 0x140   :  { %2641 = vmatprep.subr.bf16.mxu0 %v4075_v36  ;;  %2727 = vmatprep.subr.bf16.mxu1 %v4078_v37  ;;  %v4114_v36 = vld [vmem:[#allocation4 + $0x2ac] ss:$16 sps:$4 sm:$0xff]   ;;  %v4109_v37 = vld [vmem:[#allocation4 + $0x2a0] ss:$16 sps:$4 sm:$0xff]  }
 0x143   :  { %2642 = vmatpush1.bf16.msra.mxu0 %v4073_v38  ;;  %2728 = vmatpush1.bf16.msra.mxu1 %v4076_v39  ;;  %v4112_v38 = vld [vmem:[#allocation4 + $0x2a8] ss:$16 sps:$4 sm:$0xff]   ;;  %v4117_v39 = vld [vmem:[#allocation4 + $0x2c4] ss:$16 sps:$4 sm:$0xff]  }
 0x144   :  { %2654 = vmatprep.subr.bf16.mxu0 %v4081_v40  ;;  %2740 = vmatprep.subr.bf16.mxu1 %v4084_v41  ;;  %v4120_v40 = vld [vmem:[#allocation4 + $0x2cc] ss:$16 sps:$4 sm:$0xff]   ;;  %v4115_v41 = vld [vmem:[#allocation4 + $0x2c0] ss:$16 sps:$4 sm:$0xff]  }
 0x1d9   :  { %v1628_v53 = vpop.f32.mrb[0].mxu0  ;;  %v1800_v54 = vpop.f32.mrb[0].mxu1 }
 0x1da   :  { %v3584_v55 = vadd.f32 %v1628_v53, %v292_v49  ;;  %v3588_v56 = vadd.f32 %v1800_v54, %v300_v50  ;;  %v1630_v57 = vpop.f32.mrb[1].mxu0  ;;  %v1802_v58 = vpop.f32.mrb[1].mxu1  ;;  %v4132_v53 = vld [vmem:[#allocation4 + $0x30c] ss:$16 sps:$4 sm:$0xff]   ;;  %v4127_v54 = vld [vmem:[#allocation4 + $0x300] ss:$16 sps:$4 sm:$0xff]  }
 0x1db   :  { %v3585_v59 = vadd.f32 %v1630_v57, %v296_v51  ;;  %v3589_v60 = vadd.f32 %v1802_v58, %v304_v52  ;;  %v1632_v61 = vpop.f32.mrb[2].mxu0  ;;  %v1804_v62 = vpop.f32.mrb[2].mxu1  ;;  %v4138_v57 = vld [vmem:[#allocation4 + $0x32c] ss:$16 sps:$4 sm:$0xff]   ;;  %v4133_v58 = vld [vmem:[#allocation4 + $0x320] ss:$16 sps:$4 sm:$0xff]  }
 0x1dc   :  { %v3586_v63 = vadd.f32 %v1632_v61, %v292_v49  ;;  %v3590_v0 = vadd.f32 %v1804_v62, %v300_v50  ;;  %v1634_v1 = vpop.f32.mrb[3].mxu0  ;;  %v1806_v2 = vpop.f32.mrb[3].mxu1  ;;  %v1809_v5 = vmax.f32 %v3584_v55, 0.0  ;;  %v1811_v6 = vmax.f32 %v3588_v56, 0.0  ;;  %v4126_v49 = vld [vmem:[#allocation4 + $0x2ec] ss:$16 sps:$4 sm:$0xff]  }
 0x1dd   :  { %v3587_v3 = vadd.f32 %v1634_v1, %v296_v51  ;;  %v3591_v4 = vadd.f32 %v1806_v2, %v304_v52  ;;  %v1810_v9 = vmax.f32 %v3585_v59, 0.0  ;;  %v1812_v10 = vmax.f32 %v3589_v60, 0.0  ;;  %v4121_v50 = vld [vmem:[#allocation4 + $0x2e0] ss:$16 sps:$4 sm:$0xff]   ;;  %v4124_v51 = vld [vmem:[#allocation4 + $0x2e8] ss:$16 sps:$4 sm:$0xff]  }
 0x1de   :  { %v1813_v7 = vmax.f32 %v3586_v63, 0.0  ;;  %v1815_v8 = vmax.f32 %v3590_v0, 0.0  ;;  %v4129_v52 = vld [vmem:[#allocation4 + $0x304] ss:$16 sps:$4 sm:$0xff]   ;;  %v4130_v55 = vld [vmem:[#allocation4 + $0x308] ss:$16 sps:$4 sm:$0xff]  }
 0x1df   :  { %v1814_v11 = vmax.f32 %v3587_v3, 0.0  ;;  %v1816_v12 = vmax.f32 %v3591_v4, 0.0  ;;  %v4135_v56 = vld [vmem:[#allocation4 + $0x324] ss:$16 sps:$4 sm:$0xff]   ;;  %v4136_v59 = vld [vmem:[#allocation4 + $0x328] ss:$16 sps:$4 sm:$0xff]  }
 0x1e0   :  { %v1817_v13 = vpack.c.bf16 %v1813_v7, %v1809_v5  ;;  %v4362_v14 = vpack.c.bf16 %v1815_v8, %v1811_v6  ;;  %v4141_v60 = vld [vmem:[#allocation4 + $0x344] ss:$16 sps:$4 sm:$0xff]   ;;  %v4144_v61 = vld [vmem:[#allocation4 + $0x34c] ss:$16 sps:$4 sm:$0xff]   ;;  %v4139_v62 = vld [vmem:[#allocation4 + $0x340] ss:$16 sps:$4 sm:$0xff]  }
 0x1e1   :  { %v1818_v15 = vpack.c.bf16 %v1814_v11, %v1810_v9  ;;  %v1820_v16 = vpack.c.bf16 %v1816_v12, %v1812_v10  ;;  %v4142_v63 = vld [vmem:[#allocation4 + $0x348] ss:$16 sps:$4 sm:$0xff]   ;;  %v4147_v0 = vld [vmem:[#allocation4 + $0x364] ss:$16 sps:$4 sm:$0xff]   ;;  %v4150_v1 = vld [vmem:[#allocation4 + $0x36c] ss:$16 sps:$4 sm:$0xff]  }
 0x1e2   :  { %v4145_v2 = vld [vmem:[#allocation4 + $0x360] ss:$16 sps:$4 sm:$0xff]   ;;  %v4148_v3 = vld [vmem:[#allocation4 + $0x368] ss:$16 sps:$4 sm:$0xff]   ;;  %v4153_v4 = vld [vmem:[#allocation4 + $0x384] ss:$16 sps:$4 sm:$0xff]  }
 0x1e3   :  { %2643 = vmatprep.mubr.bf16.mxu0 %v1818_v15  ;;  %2729 = vmatprep.mubr.bf16.mxu1 %v1818_v15  ;;  %v4156_v5 = vld [vmem:[#allocation4 + $0x38c] ss:$16 sps:$4 sm:$0xff]   ;;  %v4151_v6 = vld [vmem:[#allocation4 + $0x380] ss:$16 sps:$4 sm:$0xff]   ;;  %v4154_v7 = vld [vmem:[#allocation4 + $0x388] ss:$16 sps:$4 sm:$0xff]  }
 0x1e4   :  { %2644 = vmatmul.mubr.bf16.vlgmr.msra.gmra.mrb[4].mxu0 %v1817_v13  ;;  %2730 = vmatmul.mubr.bf16.vlgmr.msra.gmra.mrb[4].mxu1 %v1817_v13  ;;  %v4159_v8 = vld [vmem:[#allocation4 + $0x3a4] ss:$16 sps:$4 sm:$0xff]   ;;  %v4162_v9 = vld [vmem:[#allocation4 + $0x3ac] ss:$16 sps:$4 sm:$0xff]   ;;  %v4157_v10 = vld [vmem:[#allocation4 + $0x3a0] ss:$16 sps:$4 sm:$0xff]  }
 0x1e5   :  { %2655 = vmatpush1.bf16.msra.mxu0 %v4079_v17  ;;  %2741 = vmatpush1.bf16.msra.mxu1 %v4082_v18  ;;  %v4160_v11 = vld [vmem:[#allocation4 + $0x3a8] ss:$16 sps:$4 sm:$0xff]   ;;  %v4165_v12 = vld [vmem:[#allocation4 + $0x3c4] ss:$16 sps:$4 sm:$0xff]   ;;  %v4168_v13 = vld [vmem:[#allocation4 + $0x3cc] ss:$16 sps:$4 sm:$0xff]  }
 0x1e6   :  { %2686 = vmatprep.mubr.bf16.mxu0 %v1820_v16  ;;  %2772 = vmatprep.mubr.bf16.mxu1 %v1820_v16  ;;  %v4163_v15 = vld [vmem:[#allocation4 + $0x3c0] ss:$16 sps:$4 sm:$0xff]   ;;  %v4166_v16 = vld [vmem:[#allocation4 + $0x3c8] ss:$16 sps:$4 sm:$0xff]   ;;  %v4171_v17 = vld [vmem:[#allocation4 + $0x3e4] ss:$16 sps:$4 sm:$0xff]  }
 0x1e7   :  { %2656 = vmatprep.subr.bf16.mxu0 %v4087_v19  ;;  %2742 = vmatprep.subr.bf16.mxu1 %v4090_v20  ;;  %v4174_v18 = vld [vmem:[#allocation4 + $0x3ec] ss:$16 sps:$4 sm:$0xff]   ;;  %v4169_v19 = vld [vmem:[#allocation4 + $0x3e0] ss:$16 sps:$4 sm:$0xff]   ;;  %v4172_v20 = vld [vmem:[#allocation4 + $0x3e8] ss:$16 sps:$4 sm:$0xff]  }
 0x1e9   :  { %2657 = vmatpush1.bf16.msra.mxu0 %v4085_v21  ;;  %2743 = vmatpush1.bf16.msra.mxu1 %v4088_v22  ;;  %v4175_v21 = vld [vmem:[%s4487_s5 + $0x40] sm:$0xff]  }
 0x1ea   :  { %2658 = vmatprep.subr.bf16.mxu0 %v4093_v23  ;;  %2744 = vmatprep.subr.bf16.mxu1 %v4096_v24  ;;  %v4176_v22 = vld [vmem:[%s4487_s5 + $0xc0] sm:$0xff]  }
 0x1eb   :  { %v4177_v23 = vld [vmem:[%s4487_s5] sm:$0xff]  }
 0x1ec   :  { %v4178_v24 = vld [vmem:[%s4487_s5 + $0x80] sm:$0xff]  }
 0x1ed   :  { %2659 = vmatpush1.bf16.msra.mxu0 %v4091_v25  ;;  %2745 = vmatpush1.bf16.msra.mxu1 %v4094_v26  ;;  %v4179_v25 = vld [vmem:[%s4487_s5 + $0x48] sm:$0xff]  }
 0x1ee   :  { %2660 = vmatprep.subr.bf16.mxu0 %v4099_v27  ;;  %2746 = vmatprep.subr.bf16.mxu1 %v4102_v28  ;;  %v4180_v26 = vld [vmem:[%s4487_s5 + $0xc8] sm:$0xff]  }
 0x1ef   :  { %v4181_v27 = vld [vmem:[%s4487_s5 + $0x8] sm:$0xff]  }
 0x1f0   :  { %v4182_v28 = vld [vmem:[%s4487_s5 + $0x88] sm:$0xff]  }
 0x1f1   :  { %2661 = vmatpush1.bf16.msra.mxu0 %v4097_v29  ;;  %2747 = vmatpush1.bf16.msra.mxu1 %v4100_v30  ;;  %v4183_v29 = vld [vmem:[%s4487_s5 + $0x50] sm:$0xff]  }
 0x1f2   :  { %2662 = vmatprep.subr.bf16.mxu0 %v4105_v31  ;;  %2748 = vmatprep.subr.bf16.mxu1 %v4108_v32  ;;  %v4185_v30 = vld [vmem:[%s4487_s5 + $0x10] sm:$0xff]   ;;  %v4187_v32 = vld [vmem:[%s4487_s5 + $0x58] sm:$0xff]  }
 0x1f3   :  { %v4186_v31 = vld [vmem:[%s4487_s5 + $0x90] sm:$0xff]  }
 0x1f5   :  { %2663 = vmatpush1.bf16.msra.mxu0 %v4103_v33  ;;  %2749 = vmatpush1.bf16.msra.mxu1 %v4106_v34  ;;  %v4188_v33 = vld [vmem:[%s4487_s5 + $0xd8] sm:$0xff]  }
 0x1f6   :  { %2664 = vmatprep.subr.bf16.mxu0 %v4111_v35  ;;  %2750 = vmatprep.subr.bf16.mxu1 %v4114_v36  ;;  %v4189_v34 = vld [vmem:[%s4487_s5 + $0x18] sm:$0xff]   ;;  %v4191_v36 = vld [vmem:[%s4487_s5 + $0x60] sm:$0xff]  }
 0x1f7   :  { %v4190_v35 = vld [vmem:[%s4487_s5 + $0x98] sm:$0xff]  }
 0x1f9   :  { %2665 = vmatpush1.bf16.msra.mxu0 %v4109_v37  ;;  %2751 = vmatpush1.bf16.msra.mxu1 %v4112_v38  ;;  %v4192_v37 = vld [vmem:[%s4487_s5 + $0xe0] sm:$0xff]  }
 0x1fa   :  { %2666 = vmatprep.subr.bf16.mxu0 %v4117_v39  ;;  %2752 = vmatprep.subr.bf16.mxu1 %v4120_v40  ;;  %v4193_v38 = vld [vmem:[%s4487_s5 + $0x20] sm:$0xff]   ;;  %v4195_v40 = vld [vmem:[%s4487_s5 + $0x68] sm:$0xff]  }
 0x1fb   :  { %v4194_v39 = vld [vmem:[%s4487_s5 + $0xa0] sm:$0xff]  }
 0x1fd   :  { %2667 = vmatpush1.bf16.msra.mxu0 %v4115_v41  ;;  %2753 = vmatpush1.bf16.msra.mxu1 %v4118_v42  ;;  %v4196_v41 = vld [vmem:[%s4487_s5 + $0xe8] sm:$0xff]  }
 0x1fe   :  { %2668 = vmatprep.subr.bf16.mxu0 %v4123_v46  ;;  %2754 = vmatprep.subr.bf16.mxu1 %v4126_v49  ;;  %v4197_v42 = vld [vmem:[%s4487_s5 + $0x28] sm:$0xff]   ;;  %v4199_v49 = vld [vmem:[%s4487_s5 + $0x70] sm:$0xff]  }
 0x1ff   :  { %v4198_v46 = vld [vmem:[%s4487_s5 + $0xa8] sm:$0xff]  }
 0x201   :  { %2669 = vmatpush1.bf16.msra.mxu0 %v4121_v50  ;;  %2755 = vmatpush1.bf16.msra.mxu1 %v4124_v51  ;;  %v4200_v50 = vld [vmem:[%s4487_s5 + $0xf0] sm:$0xff]  }
 0x202   :  { %2670 = vmatprep.subr.bf16.mxu0 %v4129_v52  ;;  %2756 = vmatprep.subr.bf16.mxu1 %v4132_v53  ;;  %v4201_v51 = vld [vmem:[%s4487_s5 + $0x30] sm:$0xff]   ;;  %v4203_v53 = vld [vmem:[%s4487_s5 + $0x78] sm:$0xff]  }
 0x203   :  { %v4202_v52 = vld [vmem:[%s4487_s5 + $0xb0] sm:$0xff]  }
 0x205   :  { %2671 = vmatpush1.bf16.msra.mxu0 %v4127_v54  ;;  %2757 = vmatpush1.bf16.msra.mxu1 %v4130_v55  ;;  %v4204_v54 = vld [vmem:[%s4487_s5 + $0xf8] sm:$0xff]  }
 0x206   :  { %2672 = vmatprep.subr.bf16.mxu0 %v4135_v56  ;;  %2758 = vmatprep.subr.bf16.mxu1 %v4138_v57  ;;  %v4205_v55 = vld [vmem:[%s4487_s5 + $0x38] sm:$0xff]   ;;  %v1949_v57 = vld [vmem:[%s4486_s4] sm:$0xf] }
 0x207   :  { %v4206_v56 = vld [vmem:[%s4487_s5 + $0xb8] sm:$0xff]  }
 0x209   :  { %2673 = vmatpush1.bf16.msra.mxu0 %v4133_v58  ;;  %2759 = vmatpush1.bf16.msra.mxu1 %v4136_v59  ;;  %v1954_v58 = vrot.slane %v1949_v57, %v291_v44  ;;  %v1962_v59 = vrot.slane %v1949_v57, %v299_v45 }
 0x20a   :  { %2674 = vmatprep.subr.bf16.mxu0 %v4141_v60  ;;  %2760 = vmatprep.subr.bf16.mxu1 %v4144_v61  ;;  %v1958_v60 = vrot.slane %v1949_v57, %v295_v47  ;;  %v1966_v61 = vrot.slane %v1949_v57, %v303_v48 }
 0x20d   :  { %2675 = vmatpush1.bf16.msra.mxu0 %v4139_v62  ;;  %2761 = vmatpush1.bf16.msra.mxu1 %v4142_v63 }
 0x20e   :  { %2676 = vmatprep.subr.bf16.mxu0 %v4147_v0  ;;  %2762 = vmatprep.subr.bf16.mxu1 %v4150_v1 }
 0x211   :  { %2677 = vmatpush1.bf16.msra.mxu0 %v4145_v2  ;;  %2763 = vmatpush1.bf16.msra.mxu1 %v4148_v3 }
 0x212   :  { %2678 = vmatprep.subr.bf16.mxu0 %v4153_v4  ;;  %2764 = vmatprep.subr.bf16.mxu1 %v4156_v5 }
 0x215   :  { %2679 = vmatpush1.bf16.msra.mxu0 %v4151_v6  ;;  %2765 = vmatpush1.bf16.msra.mxu1 %v4154_v7 }
 0x216   :  { %2680 = vmatprep.subr.bf16.mxu0 %v4159_v8  ;;  %2766 = vmatprep.subr.bf16.mxu1 %v4162_v9 }
 0x219   :  { %2681 = vmatpush1.bf16.msra.mxu0 %v4157_v10  ;;  %2767 = vmatpush1.bf16.msra.mxu1 %v4160_v11 }
 0x21a   :  { %2682 = vmatprep.subr.bf16.mxu0 %v4165_v12  ;;  %2768 = vmatprep.subr.bf16.mxu1 %v4168_v13 }
 0x21d   :  { %2683 = vmatpush1.bf16.msra.mxu0 %v4163_v15  ;;  %2769 = vmatpush1.bf16.msra.mxu1 %v4166_v16 }
 0x21e   :  { %2684 = vmatprep.subr.bf16.mxu0 %v4171_v17  ;;  %2770 = vmatprep.subr.bf16.mxu1 %v4174_v18 }
 0x221   :  { %2685 = vmatpush1.bf16.msra.mxu0 %v4169_v19  ;;  %2771 = vmatpush1.bf16.msra.mxu1 %v4172_v20 }
 0x222   :  { %3540 = vmatprep.subr.bf16.mxu0 %v4175_v21  ;;  %3562 = vmatprep.subr.bf16.mxu1 %v4176_v22 }
 0x224   :  { %2687 = vmatmul.mubr.bf16.vlgmr.msra.gmra.mrb[4].mxu0 %v4362_v14  ;;  %2773 = vmatmul.mubr.bf16.vlgmr.msra.gmra.mrb[4].mxu1 %v4362_v14  ;;  %v4184_v14 = vld [vmem:[%s4487_s5 + $0xd0] sm:$0xff]  }
 0x225   :  { %3541 = vmatpush3.bf16.msra.mxu0 %v4177_v23  ;;  %3563 = vmatpush3.bf16.msra.mxu1 %v4178_v24  ;;  %v3507_v24 = vld [vmem:[%s4488_s6] ss:$0 sm:$0xff] }
 0x226   :  { %3542 = vmatprep.subr.bf16.mxu0 %v4179_v25  ;;  %3564 = vmatprep.subr.bf16.mxu1 %v4180_v26 }
 0x229   :  { %3543 = vmatpush3.bf16.msra.mxu0 %v4181_v27  ;;  %3565 = vmatpush3.bf16.msra.mxu1 %v4182_v28 }
 0x22a   :  { %3544 = vmatprep.subr.bf16.mxu0 %v4183_v29  ;;  %3566 = vmatprep.subr.bf16.mxu1 %v4184_v14 }
 0x22d   :  { %3545 = vmatpush3.bf16.msra.mxu0 %v4185_v30  ;;  %3567 = vmatpush3.bf16.msra.mxu1 %v4186_v31 }
 0x22e   :  { %3546 = vmatprep.subr.bf16.mxu0 %v4187_v32  ;;  %3568 = vmatprep.subr.bf16.mxu1 %v4188_v33 }
 0x231   :  { %3547 = vmatpush3.bf16.msra.mxu0 %v4189_v34  ;;  %3569 = vmatpush3.bf16.msra.mxu1 %v4190_v35 }
 0x232   :  { %3548 = vmatprep.subr.bf16.mxu0 %v4191_v36  ;;  %3570 = vmatprep.subr.bf16.mxu1 %v4192_v37 }
 0x235   :  { %3549 = vmatpush3.bf16.msra.mxu0 %v4193_v38  ;;  %3571 = vmatpush3.bf16.msra.mxu1 %v4194_v39 }
 0x236   :  { %3550 = vmatprep.subr.bf16.mxu0 %v4195_v40  ;;  %3572 = vmatprep.subr.bf16.mxu1 %v4196_v41 }
 0x239   :  { %3551 = vmatpush3.bf16.msra.mxu0 %v4197_v42  ;;  %3573 = vmatpush3.bf16.msra.mxu1 %v4198_v46 }
 0x23a   :  { %3552 = vmatprep.subr.bf16.mxu0 %v4199_v49  ;;  %3574 = vmatprep.subr.bf16.mxu1 %v4200_v50 }
 0x23d   :  { %3553 = vmatpush3.bf16.msra.mxu0 %v4201_v51  ;;  %3575 = vmatpush3.bf16.msra.mxu1 %v4202_v52 }
 0x23e   :  { %3554 = vmatprep.subr.bf16.mxu0 %v4203_v53  ;;  %3576 = vmatprep.subr.bf16.mxu1 %v4204_v54 }
 0x241   :  { %3555 = vmatpush3.bf16.msra.mxu0 %v4205_v55  ;;  %3577 = vmatpush3.bf16.msra.mxu1 %v4206_v56 }
 0x2f7   :  { %v2688_v62 = vpop.f32.mrb[4].mxu0  ;;  %v2774_v63 = vpop.f32.mrb[4].mxu1 }
 0x2f8   :  { %v3592_v0 = vadd.f32 %v2688_v62, %v1954_v58  ;;  %v3596_v1 = vadd.f32 %v2774_v63, %v1962_v59  ;;  %v2690_v2 = vpop.f32.mrb[5].mxu0  ;;  %v2776_v3 = vpop.f32.mrb[5].mxu1 }
 0x2f9   :  { %v3593_v4 = vadd.f32 %v2690_v2, %v1958_v60  ;;  %v3597_v5 = vadd.f32 %v2776_v3, %v1966_v61  ;;  %v2692_v6 = vpop.f32.mrb[6].mxu0  ;;  %v2778_v7 = vpop.f32.mrb[6].mxu1 }
 0x2fa   :  { %v3594_v44 = vadd.f32 %v2692_v6, %v1954_v58  ;;  %v3598_v8 = vadd.f32 %v2778_v7, %v1962_v59  ;;  %v2694_v9 = vpop.f32.mrb[7].mxu0  ;;  %v2780_v45 = vpop.f32.mrb[7].mxu1  ;;  %v2783_v47 = vmax.f32 %v3592_v0, 0.0  ;;  %v2785_v12 = vmax.f32 %v3596_v1, 0.0 }
 0x2fb   :  { %v3595_v10 = vadd.f32 %v2694_v9, %v1958_v60  ;;  %v3599_v11 = vadd.f32 %v2780_v45, %v1966_v61  ;;  %v2784_v13 = vmax.f32 %v3593_v4, 0.0  ;;  %v2786_v15 = vmax.f32 %v3597_v5, 0.0 }
 0x2fc   :  { %v2787_v43 = vmax.f32 %v3594_v44, 0.0  ;;  %v2789_v48 = vmax.f32 %v3598_v8, 0.0 }
 0x2fd   :  { %v2788_v16 = vmax.f32 %v3595_v10, 0.0  ;;  %v2790_v17 = vmax.f32 %v3599_v11, 0.0 }
 0x2fe   :  { %v2791_v18 = vpack.c.bf16 %v2787_v43, %v2783_v47  ;;  %v2793_v19 = vpack.c.bf16 %v2789_v48, %v2785_v12 }
 0x2ff   :  { %v2792_v20 = vpack.c.bf16 %v2788_v16, %v2784_v13  ;;  %v2794_v21 = vpack.c.bf16 %v2790_v17, %v2786_v15 }
 0x301   :  { %3090 = vmatprep.mubr.bf16.mxu0 %v2792_v20  ;;  %3131 = vmatprep.mubr.bf16.mxu1 %v2794_v21 }
 0x302   :  { %3091 = vmatmul.mubr.bf16.vlgmr.msra.gmra.mrb[8].mxu0 %v2791_v18  ;;  %3132 = vmatmul.mubr.bf16.vlgmr.msra.gmra.mrb[8].mxu1 %v2793_v19 }
 0x3d5   :  { %v3556_v22 = vpop.f32.mrb[8].mxu0  ;;  %v3578_v23 = vpop.f32.mrb[8].mxu1 }
 0x3d6   :  { %v3557_v25 = vpop.f32.mrb[9].mxu0  ;;  %v3579_v26 = vpop.f32.mrb[9].mxu1 }
 0x3d7   :  { %v3558_v27 = vadd.f32 %v3557_v25, %v3556_v22  ;;  %v3580_v28 = vadd.f32 %v3579_v26, %v3578_v23  ;;  %v3559_v29 = vpop.f32.mrb[10].mxu0  ;;  %v3581_v14 = vpop.f32.mrb[10].mxu1 }
 0x3d8   :  { %v3560_v30 = vpop.f32.mrb[11].mxu0  ;;  %v3582_v31 = vpop.f32.mrb[11].mxu1 }
 0x3d9   :  { %v3093_v32 = vadd.f32 %v3558_v27, %v3507_v24  ;;  %v3561_v33 = vadd.f32 %v3560_v30, %v3559_v29  ;;  %v3583_v34 = vadd.f32 %v3582_v31, %v3581_v14 }
 0x3db   :  { %v3134_v35 = vadd.f32 %v3580_v28, %v3093_v32  ;;  %v3096_v36 = vadd.f32 %v3561_v33, %v3507_v24 }
 0x3dd   :  { %3140 = vst [vmem:[%s4489_s7] sm:$0xff] %v3134_v35  ;;  %v3137_v37 = vadd.f32 %v3583_v34, %v3096_v36 }
 0x3df   :  { %3141 = vst [vmem:[%s4489_s7 + $0x8] sm:$0xff] %v3137_v37 }
 0x3e0   :  { %3146 = vsyncpa [#allocation3], 1 }
 0x3e1   :  { %3147 = vsyncpa [#allocation5], 1 }

</bundles_post_ra>
